<compile_context>
chip_gen: v5e
topology: v5e:2x2
jax: 0.10.0
libtpu: 0.0.40
codegen_flags: <defaults>
</compile_context>

<pallas_src>
import numpy as np
import jax
import jax.numpy as jnp
from jax.experimental import pallas as pl
from jax.experimental.pallas import tpu as pltpu

n_qubits = 10
n_layers = 10
DIM = 2 ** n_qubits        # 1024 amplitudes
N_OUT = 10                 # nn.Linear(1, 10)
TN = 512                   # column tile of the observable matrix A


# --------------------------------------------------------------------------
# Host-side (glue): build the exact circuit unitary from the QNode weights,
# then fold it with the PauliZ(0) observable into a real symmetric matrix.
# Wire 0 is the most-significant bit (PennyLane's default basis ordering).
# --------------------------------------------------------------------------
def _rx(theta):
    c, s = np.cos(theta / 2.0), np.sin(theta / 2.0)
    return np.array([[c, -1j * s], [-1j * s, c]], dtype=np.complex128)


def _rz(phi):
    return np.array([[np.exp(-1j * phi / 2.0), 0.0],
                     [0.0, np.exp(1j * phi / 2.0)]], dtype=np.complex128)


_CNOT = np.array([[1, 0, 0, 0],
                  [0, 1, 0, 0],
                  [0, 0, 0, 1],
                  [0, 0, 1, 0]], dtype=np.complex128)


def _apply_gate(U, gate, wires):
    # U has shape (2,)*n_qubits + (DIM,); gate acts on the row (state) index.
    k = len(wires)
    g = gate.reshape((2,) * (2 * k))
    out = np.tensordot(g, U, axes=(list(range(k, 2 * k)), list(wires)))
    return np.moveaxis(out, list(range(k)), list(wires))


def build_circuit_unitary(weights):
    """weights: (n_layers, n_qubits, 2) -> full circuit unitary (DIM, DIM)."""
    U = np.eye(DIM, dtype=np.complex128).reshape((2,) * n_qubits + (DIM,))
    for layer in range(n_layers):
        for i in range(n_qubits):
            U = _apply_gate(U, _rx(weights[layer, i, 1]), (i,))
            U = _apply_gate(U, _rz(weights[layer, i, 0]), (i,))
        for i in range(1, n_qubits - 1, 2):
            U = _apply_gate(U, _CNOT, (i, i + 1))
        for i in range(0, n_qubits - 1, 2):
            U = _apply_gate(U, _CNOT, (i, i + 1))
        for i in range(1, n_qubits - 1, 2):
            U = _apply_gate(U, _CNOT, (i, i + 1))
        for i in range(0, n_qubits - 1, 2):
            U = _apply_gate(U, _CNOT, (i, i + 1))
        for i in range(n_qubits):
            U = _apply_gate(U, _rz(weights[layer, i, 0]), (i,))
            U = _apply_gate(U, _rx(weights[layer, i, 1]), (i,))
    return U.reshape(DIM, DIM)


def build_observable_matrix(weights):
    """A = Re(U^H diag(sign) U), symmetric; expval = x^T A x for real x."""
    U = build_circuit_unitary(weights)
    signs = np.where(np.arange(DIM) < DIM // 2, 1.0, -1.0)
    M = U.conj().T @ (signs[:, None] * U)          # Hermitian
    A = np.real(M)
    A = 0.5 * (A + A.T)                            # kill anti-symmetric residue
    return A, U, signs


# --------------------------------------------------------------------------
# Pallas kernel: prep (once per batch block) + tiled x@A accumulation + tail.
# --------------------------------------------------------------------------
def quantum_classifier_kernel(x_ref, a_ref, w_ref, b_ref, out_ref,
                              xf_ref, xb_ref, acc_ref):
    n = pl.program_id(1)
    n_tiles = pl.num_programs(1)
    tn = a_ref.shape[1]

    @pl.when(n == 0)
    def _prep():
        x = x_ref[...]                                  # (bm, DIM) f32
        # torch.nan_to_num(x, 0.0, 1.0, -1.0)
        x = jnp.where(x != x, 0.0, x)
        x = jnp.where(x == jnp.inf, 1.0, x)
        x = jnp.where(x == -jnp.inf, -1.0, x)
        # F.normalize(x + 1e-8, p=2, dim=1)   (torch default eps = 1e-12)
        x = x + 1e-8
        nrm = jnp.sqrt(jnp.sum(x * x, axis=1, keepdims=True))
        x = x / jnp.maximum(nrm, 1e-12)
        # quantum_circuit: clip(-1, 1) + AmplitudeEmbedding(normalize=True)
        x = jnp.clip(x, -1.0, 1.0)
        nrm2 = jnp.sqrt(jnp.sum(x * x, axis=1, keepdims=True))
        x = x / nrm2
        xb_ref[...] = x.astype(jnp.bfloat16)            # MXU operand (bf16)
        for t in range(xf_ref.shape[0]):                # per-tile f32 copies
            xf_ref[t] = x[:, t * tn:(t + 1) * tn]
        acc_ref[...] = jnp.zeros_like(acc_ref)

    # y = (x @ A)[:, n*tn:(n+1)*tn]  -- bf16 x bf16, f32 accumulation on MXU.
    y = jnp.dot(xb_ref[...], a_ref[...], preferred_element_type=jnp.float32)
    # expval accumulation over this column tile: sum_k x[b,k] * y[b,k]
    acc_ref[...] += jnp.sum(xf_ref[n] * y, axis=1, keepdims=True)

    @pl.when(n == n_tiles - 1)
    def _finalize():
        expval = acc_ref[...]                           # (bm, 1) == <Z_0>
        # nn.Linear(1, 10):  logits = expval @ W^T + b
        logits = expval * w_ref[...] + b_ref[...]       # (bm, N_OUT)
        # log_softmax(dim=1)
        m = jnp.max(logits, axis=1, keepdims=True)
        z = logits - m
        lse = jnp.log(jnp.sum(jnp.exp(z), axis=1, keepdims=True))
        out_ref[...] = z - lse


def quantum_classifier_forward(x, a_bf16, w_t, b, *, tn=TN):
    B = x.shape[0]
    # Batch block: full batch for tiny B; 128-row (sublane-aligned) blocks
    # otherwise so the "parallel" axis can split across v7x's two TensorCores.
    bm = min(B, 128) if (B % 8 == 0) else B
    n_b = pl.cdiv(B, bm)
    n_tiles = DIM // tn

    return pl.pallas_call(
        quantum_classifier_kernel,
        out_shape=jax.ShapeDtypeStruct((B, N_OUT), jnp.float32),
        grid_spec=pltpu.PrefetchScalarGridSpec(
            num_scalar_prefetch=0,
            grid=(n_b, n_tiles),
            in_specs=[
                pl.BlockSpec((bm, DIM), lambda bi, n: (bi, 0)),   # x
                pl.BlockSpec((DIM, tn), lambda bi, n: (0, n)),    # A col tiles
                pl.BlockSpec((1, N_OUT), lambda bi, n: (0, 0)),   # W^T
                pl.BlockSpec((1, N_OUT), lambda bi, n: (0, 0)),   # bias
            ],
            out_specs=pl.BlockSpec((bm, N_OUT), lambda bi, n: (bi, 0)),
            scratch_shapes=[
                pltpu.VMEM((n_tiles, bm, tn), jnp.float32),   # normalized x tiles
                pltpu.VMEM((bm, DIM), jnp.bfloat16),          # bf16 x for MXU
                pltpu.VMEM((bm, 1), jnp.float32),             # expval accumulator
            ]),
        compiler_params=pltpu.CompilerParams(
            dimension_semantics=("parallel", "arbitrary")),
    )(x, a_bf16, w_t, b)


# --------------------------------------------------------------------------
if __name__ == "__main__":
    key = jax.random.PRNGKey(0)
    kx, kw, kwl, kbl = jax.random.split(key, 4)

    B = 2
    x = jax.random.normal(kx, (B, DIM), dtype=jnp.float32)
    # exercise nan_to_num(0.0, 1.0, -1.0)
    x = x.at[0, 0].set(jnp.nan).at[0, 1].set(jnp.inf).at[1, 0].set(-jnp.inf)

    # Deterministic parameter init (matching the module's shapes).
    q_weights = np.asarray(
        jax.random.normal(kw, (n_layers, n_qubits, 2), dtype=jnp.float32),
        dtype=np.float64)                                   # (10, 10, 2)
    w_lin = np.asarray(
        jax.random.uniform(kwl, (N_OUT, 1), minval=-1.0, maxval=1.0),
        dtype=np.float64)                                   # Linear weight (10, 1)
    b_lin = np.asarray(
        jax.random.uniform(kbl, (N_OUT,), minval=-1.0, maxval=1.0),
        dtype=np.float64)                                   # Linear bias (10,)

    # Host "parameter setup": fold circuit + observable into A (weights-only).
    A, U, signs_np = build_observable_matrix(q_weights)     # (1024, 1024) real
    a_bf16 = jnp.asarray(A, dtype=jnp.bfloat16)
    w_t = jnp.asarray(w_lin.reshape(1, N_OUT), dtype=jnp.float32)
    b = jnp.asarray(b_lin.reshape(1, N_OUT), dtype=jnp.float32)

    out = quantum_classifier_forward(x, a_bf16, w_t, b)
    out = jax.block_until_ready(out)

    # numpy reference (float64, full state-vector path) for a sanity check
    x_np = np.asarray(x, dtype=np.float64)
    x_np = np.nan_to_num(x_np, nan=0.0, posinf=1.0, neginf=-1.0)
    x_np = x_np + 1e-8
    x_np = x_np / np.maximum(np.linalg.norm(x_np, axis=1, keepdims=True), 1e-12)
    x_np = np.clip(x_np, -1.0, 1.0)
    x_np = x_np / np.linalg.norm(x_np, axis=1, keepdims=True)
    psi = x_np @ U.T
    expval = (np.abs(psi) ** 2 * signs_np[None, :]).sum(axis=1, keepdims=True)
    logits = expval @ w_lin.T + b_lin[None, :]
    m = logits.max(axis=1, keepdims=True)
    z = logits - m
    ref = z - np.log(np.exp(z).sum(axis=1, keepdims=True))

    out_np = np.asarray(out)
    assert out_np.shape == (B, N_OUT)
    assert np.isfinite(out_np).all()
    assert np.max(np.abs(out_np - ref)) < 5e-2, np.max(np.abs(out_np - ref))
    print("KERNEL_OK")
</pallas_src>

<mosaic_0001>
module attributes {stable_mosaic.version = 11 : i64} {
  func.func @quantum_classifier_kernel(%arg0: i32, %arg1: i32, %arg2: memref<2x1024xf32, #tpu.memory_space<vmem>>, %arg3: memref<1024x512xbf16, #tpu.memory_space<vmem>>, %arg4: memref<1x10xf32, #tpu.memory_space<vmem>>, %arg5: memref<1x10xf32, #tpu.memory_space<vmem>>, %arg6: memref<2x10xf32, #tpu.memory_space<vmem>>, %arg7: memref<2x2x512xf32, #tpu.memory_space<vmem>>, %arg8: memref<2x1024xbf16, #tpu.memory_space<vmem>>, %arg9: memref<2x1xf32, #tpu.memory_space<vmem>>) attributes {dimension_semantics = [#tpu.dimension_semantics<parallel>, #tpu.dimension_semantics<arbitrary>], iteration_bounds = array<i64: 1, 2>, scalar_prefetch = 0 : i64, scratch_operands = 3 : i64, tpu.core_type = #tpu.core_type<tc>, window_params = [{transform_indices = @transform_0, window_bounds = array<i64: 2, 1024>}, {transform_indices = @transform_1, window_bounds = array<i64: 1024, 512>}, {pipeline_mode = #tpu.pipeline_mode<synchronous>, transform_indices = @transform_2, window_bounds = array<i64: 1, 10>}, {pipeline_mode = #tpu.pipeline_mode<synchronous>, transform_indices = @transform_3, window_bounds = array<i64: 1, 10>}, {transform_indices = @transform_4, window_bounds = array<i64: 2, 10>}]} {
    %c0_i32 = arith.constant 0 : i32
    %0 = arith.cmpi eq, %arg1, %c0_i32 : i32
    %1 = arith.extui %0 : i1 to i32
    %c0_i32_0 = arith.constant 0 : i32
    %2 = arith.cmpi ne, %1, %c0_i32_0 : i32
    scf.if %2 {
      %c0_12 = arith.constant 0 : index
      %c0_13 = arith.constant 0 : index
      %18 = vector.load %arg2[%c0_12, %c0_13] : memref<2x1024xf32, #tpu.memory_space<vmem>>, vector<2x1024xf32>
      %19 = arith.cmpf one, %18, %18 : vector<2x1024xf32>
      %cst_14 = arith.constant 0.000000e+00 : f32
      %20 = vector.broadcast %cst_14 : f32 to vector<2x1024xf32>
      %21 = arith.select %19, %20, %18 : vector<2x1024xi1>, vector<2x1024xf32>
      %cst_15 = arith.constant 0x7F800000 : f32
      %22 = vector.broadcast %cst_15 : f32 to vector<2x1024xf32>
      %23 = arith.cmpf oeq, %21, %22 : vector<2x1024xf32>
      %cst_16 = arith.constant 1.000000e+00 : f32
      %24 = vector.broadcast %cst_16 : f32 to vector<2x1024xf32>
      %25 = arith.select %23, %24, %21 : vector<2x1024xi1>, vector<2x1024xf32>
      %cst_17 = arith.constant 0xFF800000 : f32
      %26 = vector.broadcast %cst_17 : f32 to vector<2x1024xf32>
      %27 = arith.cmpf oeq, %25, %26 : vector<2x1024xf32>
      %cst_18 = arith.constant -1.000000e+00 : f32
      %28 = vector.broadcast %cst_18 : f32 to vector<2x1024xf32>
      %29 = arith.select %27, %28, %25 : vector<2x1024xi1>, vector<2x1024xf32>
      %cst_19 = arith.constant 9.99999993E-9 : f32
      %30 = vector.broadcast %cst_19 : f32 to vector<2x1024xf32>
      %31 = arith.addf %29, %30 : vector<2x1024xf32>
      %32 = arith.mulf %31, %31 : vector<2x1024xf32>
      %cst_20 = arith.constant dense<0.000000e+00> : vector<2xf32>
      %33 = vector.multi_reduction <add>, %32, %cst_20 [1] : vector<2x1024xf32> to vector<2xf32>
      %34 = vector.shape_cast %33 : vector<2xf32> to vector<2x1xf32>
      %35 = math.sqrt %34 : vector<2x1xf32>
      %cst_21 = arith.constant 9.99999996E-13 : f32
      %36 = vector.broadcast %cst_21 : f32 to vector<2x1xf32>
      %37 = arith.maximumf %35, %36 : vector<2x1xf32>
      %38 = vector.broadcast %37 : vector<2x1xf32> to vector<2x1024xf32>
      %39 = arith.divf %31, %38 : vector<2x1024xf32>
      %cst_22 = arith.constant -1.000000e+00 : f32
      %cst_23 = arith.constant 1.000000e+00 : f32
      %40 = vector.broadcast %cst_22 : f32 to vector<2x1024xf32>
      %41 = arith.maximumf %40, %39 : vector<2x1024xf32>
      %42 = vector.broadcast %cst_23 : f32 to vector<2x1024xf32>
      %43 = arith.minimumf %42, %41 : vector<2x1024xf32>
      %44 = arith.mulf %43, %43 : vector<2x1024xf32>
      %cst_24 = arith.constant dense<0.000000e+00> : vector<2xf32>
      %45 = vector.multi_reduction <add>, %44, %cst_24 [1] : vector<2x1024xf32> to vector<2xf32>
      %46 = vector.shape_cast %45 : vector<2xf32> to vector<2x1xf32>
      %47 = math.sqrt %46 : vector<2x1xf32>
      %48 = vector.broadcast %47 : vector<2x1xf32> to vector<2x1024xf32>
      %49 = arith.divf %43, %48 : vector<2x1024xf32>
      %50 = arith.truncf %49 : vector<2x1024xf32> to vector<2x1024xbf16>
      %c0_25 = arith.constant 0 : index
      %c0_26 = arith.constant 0 : index
      %51 = vector.load %arg8[%c0_25, %c0_26] : memref<2x1024xbf16, #tpu.memory_space<vmem>>, vector<2x1024xbf16>
      tpu.vector_store %arg8[%c0_25, %c0_26], %50 {strides = array<i32>} : memref<2x1024xbf16, #tpu.memory_space<vmem>>, vector<2x1024xbf16>,
      %52 = vector.extract_strided_slice %49 {offsets = [0, 0], sizes = [2, 512], strides = [1, 1]} : vector<2x1024xf32> to vector<2x512xf32>
      %c0_27 = arith.constant 0 : index
      %c0_28 = arith.constant 0 : index
      %c0_29 = arith.constant 0 : index
      %53 = vector.load %arg7[%c0_27, %c0_28, %c0_29] : memref<2x2x512xf32, #tpu.memory_space<vmem>>, vector<1x2x512xf32>
      %54 = vector.shape_cast %53 : vector<1x2x512xf32> to vector<2x512xf32>
      %55 = vector.shape_cast %52 : vector<2x512xf32> to vector<1x2x512xf32>
      tpu.vector_store %arg7[%c0_27, %c0_28, %c0_29], %55 {strides = array<i32>} : memref<2x2x512xf32, #tpu.memory_space<vmem>>, vector<1x2x512xf32>,
      %56 = vector.extract_strided_slice %49 {offsets = [0, 512], sizes = [2, 512], strides = [1, 1]} : vector<2x1024xf32> to vector<2x512xf32>
      %c1 = arith.constant 1 : index
      %c0_30 = arith.constant 0 : index
      %c0_31 = arith.constant 0 : index
      %57 = vector.load %arg7[%c1, %c0_30, %c0_31] : memref<2x2x512xf32, #tpu.memory_space<vmem>>, vector<1x2x512xf32>
      %58 = vector.shape_cast %57 : vector<1x2x512xf32> to vector<2x512xf32>
      %59 = vector.shape_cast %56 : vector<2x512xf32> to vector<1x2x512xf32>
      tpu.vector_store %arg7[%c1, %c0_30, %c0_31], %59 {strides = array<i32>} : memref<2x2x512xf32, #tpu.memory_space<vmem>>, vector<1x2x512xf32>,
      %cst_32 = arith.constant 0.000000e+00 : f32
      %60 = vector.broadcast %cst_32 : f32 to vector<2x1xf32>
      %c0_33 = arith.constant 0 : index
      %c0_34 = arith.constant 0 : index
      %61 = vector.load %arg9[%c0_33, %c0_34] : memref<2x1xf32, #tpu.memory_space<vmem>>, vector<2x1xf32>
      tpu.vector_store %arg9[%c0_33, %c0_34], %60 {strides = array<i32>} : memref<2x1xf32, #tpu.memory_space<vmem>>, vector<2x1xf32>,
    } else {
    }
    %c0 = arith.constant 0 : index
    %c0_1 = arith.constant 0 : index
    %3 = vector.load %arg8[%c0, %c0_1] : memref<2x1024xbf16, #tpu.memory_space<vmem>>, vector<2x1024xbf16>
    %c0_2 = arith.constant 0 : index
    %c0_3 = arith.constant 0 : index
    %4 = vector.load %arg3[%c0_2, %c0_3] : memref<1024x512xbf16, #tpu.memory_space<vmem>>, vector<1024x512xbf16>
    %cst = arith.constant dense<0.000000e+00> : vector<2x512xf32>
    %5 = tpu.matmul %3, %4, %cst {dimension_numbers = #tpu.dot_dimension_numbers<[1], [0], [0], [1], [0, 0, 1, 1], [], []>} : vector<2x1024xbf16>, vector<1024x512xbf16>, vector<2x512xf32> -> vector<2x512xf32>
    %c0_4 = arith.constant 0 : index
    %c0_5 = arith.constant 0 : index
    %6 = vector.load %arg9[%c0_4, %c0_5] : memref<2x1xf32, #tpu.memory_space<vmem>>, vector<2x1xf32>
    %7 = arith.index_cast %arg1 : i32 to index
    %c0_6 = arith.constant 0 : index
    %c0_7 = arith.constant 0 : index
    %8 = vector.load %arg7[%7, %c0_6, %c0_7] : memref<2x2x512xf32, #tpu.memory_space<vmem>>, vector<1x2x512xf32>
    %9 = vector.shape_cast %8 : vector<1x2x512xf32> to vector<2x512xf32>
    %10 = arith.mulf %9, %5 : vector<2x512xf32>
    %cst_8 = arith.constant dense<0.000000e+00> : vector<2xf32>
    %11 = vector.multi_reduction <add>, %10, %cst_8 [1] : vector<2x512xf32> to vector<2xf32>
    %12 = vector.shape_cast %11 : vector<2xf32> to vector<2x1xf32>
    %13 = arith.addf %6, %12 : vector<2x1xf32>
    %c0_9 = arith.constant 0 : index
    %c0_10 = arith.constant 0 : index
    %14 = vector.load %arg9[%c0_9, %c0_10] : memref<2x1xf32, #tpu.memory_space<vmem>>, vector<2x1xf32>
    tpu.vector_store %arg9[%c0_9, %c0_10], %13 {strides = array<i32>} : memref<2x1xf32, #tpu.memory_space<vmem>>, vector<2x1xf32>,
    %c1_i32 = arith.constant 1 : i32
    %15 = arith.cmpi eq, %arg1, %c1_i32 : i32
    %16 = arith.extui %15 : i1 to i32
    %c0_i32_11 = arith.constant 0 : i32
    %17 = arith.cmpi ne, %16, %c0_i32_11 : i32
    scf.if %17 {
      %c0_12 = arith.constant 0 : index
      %c0_13 = arith.constant 0 : index
      %18 = vector.load %arg9[%c0_12, %c0_13] : memref<2x1xf32, #tpu.memory_space<vmem>>, vector<2x1xf32>
      %c0_14 = arith.constant 0 : index
      %c0_15 = arith.constant 0 : index
      %19 = vector.load %arg4[%c0_14, %c0_15] : memref<1x10xf32, #tpu.memory_space<vmem>>, vector<1x10xf32>
      %20 = vector.broadcast %18 : vector<2x1xf32> to vector<2x10xf32>
      %21 = vector.broadcast %19 : vector<1x10xf32> to vector<2x10xf32>
      %22 = arith.mulf %20, %21 : vector<2x10xf32>
      %c0_16 = arith.constant 0 : index
      %c0_17 = arith.constant 0 : index
      %23 = vector.load %arg5[%c0_16, %c0_17] : memref<1x10xf32, #tpu.memory_space<vmem>>, vector<1x10xf32>
      %24 = vector.broadcast %23 : vector<1x10xf32> to vector<2x10xf32>
      %25 = arith.addf %22, %24 : vector<2x10xf32>
      %cst_18 = arith.constant dense<0xFF800000> : vector<2xf32>
      %26 = vector.multi_reduction <maximumf>, %25, %cst_18 [1] : vector<2x10xf32> to vector<2xf32>
      %27 = vector.shape_cast %26 : vector<2xf32> to vector<2x1xf32>
      %28 = vector.broadcast %27 : vector<2x1xf32> to vector<2x10xf32>
      %29 = arith.subf %25, %28 : vector<2x10xf32>
      %30 = math.exp %29 : vector<2x10xf32>
      %cst_19 = arith.constant dense<0.000000e+00> : vector<2xf32>
      %31 = vector.multi_reduction <add>, %30, %cst_19 [1] : vector<2x10xf32> to vector<2xf32>
      %32 = vector.shape_cast %31 : vector<2xf32> to vector<2x1xf32>
      %33 = math.log %32 : vector<2x1xf32>
      %34 = vector.broadcast %33 : vector<2x1xf32> to vector<2x10xf32>
      %35 = arith.subf %29, %34 : vector<2x10xf32>
      %c0_20 = arith.constant 0 : index
      %c0_21 = arith.constant 0 : index
      %36 = vector.load %arg6[%c0_20, %c0_21] : memref<2x10xf32, #tpu.memory_space<vmem>>, vector<2x10xf32>
      tpu.vector_store %arg6[%c0_20, %c0_21], %35 {strides = array<i32>} : memref<2x10xf32, #tpu.memory_space<vmem>>, vector<2x10xf32>,
    } else {
    }
    return
  }
  func.func @transform_0(%arg0: i32, %arg1: i32) -> (i32, i32) {
    %c0_i32 = arith.constant 0 : i32
    %c0_i32_0 = arith.constant 0 : i32
    return %arg0, %c0_i32 : i32, i32
  }
  func.func @transform_1(%arg0: i32, %arg1: i32) -> (i32, i32) {
    %c0_i32 = arith.constant 0 : i32
    %c0_i32_0 = arith.constant 0 : i32
    return %c0_i32, %arg1 : i32, i32
  }
  func.func @transform_2(%arg0: i32, %arg1: i32) -> (i32, i32) {
    %c0_i32 = arith.constant 0 : i32
    %c0_i32_0 = arith.constant 0 : i32
    %c0_i32_1 = arith.constant 0 : i32
    return %c0_i32, %c0_i32_0 : i32, i32
  }
  func.func @transform_3(%arg0: i32, %arg1: i32) -> (i32, i32) {
    %c0_i32 = arith.constant 0 : i32
    %c0_i32_0 = arith.constant 0 : i32
    %c0_i32_1 = arith.constant 0 : i32
    return %c0_i32, %c0_i32_0 : i32, i32
  }
  func.func @transform_4(%arg0: i32, %arg1: i32) -> (i32, i32) {
    %c0_i32 = arith.constant 0 : i32
    %c0_i32_0 = arith.constant 0 : i32
    return %arg0, %c0_i32 : i32, i32
  }
}

</mosaic_0001>

<bundles_post_ra>
// kernel: tpu_custom_call.1
= control target key start
LH: loop header
LB: loop body
LE: loop exit
PB: predicated region body
PF: predicated region fallthrough
CT: control target
= control target key end

     0   :  { %s5120_s0 = inlined_call_operand.hbm [shape: f32[2,1024], index: 0, kind: input, shape index: {}]   ;;  %s5121_s1 = inlined_call_operand.hbm [shape: bf16[1024,1024], index: 1, kind: input, shape index: {}]   ;;  %s5122_s2 = inlined_call_operand.hbm [shape: f32[1,10], index: 2, kind: input, shape index: {}]   ;;  %s5123_s3 = inlined_call_operand.hbm [shape: f32[1,10], index: 3, kind: input, shape index: {}]   ;;  %s5124_s4 = inlined_call_operand.hbm [shape: f32[2,10], index: 4, kind: output, shape index: {}]  }
   0x1   :  { %5125 = sst [smem:[#allocation19_spill]] %s5120_s0 }
   0x2   :  { %9 = vsyncpa [#allocation6], 0 }
   0x3   :  { %10 = vsyncpa [#allocation9], 0 }
   0x4   :  { %12 = vsyncpa [#allocation9 + $0x1], 0 }
   0x5   :  { %13 = vsyncpa [#allocation12], 0 }
   0x6   :  { %14 = vsyncpa [#allocation7], 0  ;;  %s4347_s15 = smov 0   ;;  %s4349_s16 = smov 0  }
   0x7   :  { %s4351_s17 = smov 0   ;;  %s4353_s18 = smov 0  }
   0x8   :  { %s4355_s19 = smov 0   ;;  %s4357_s20 = smov 0  }
   0x9 LB: > { %s4376_s21 = sadd.s32 4294967295, %s4310_s20   ;;  %s65_s22 = sadd.s32 1, %s4298_s17  ;;  %s4310_s20 = sphi %s4357_s20, %s20_s20   ;;  %s4306_s19 = sphi %s4355_s19, %s5136_s19   ;;  %s4302_s18 = sphi %s4353_s18, %s5135_s18   ;;  %s4298_s17 = sphi %s4351_s17, %s5134_s17   ;;  %s4294_s16 = sphi %s4349_s16, %s5133_s16   ;;  %s4290_s15 = sphi %s4347_s15, %s5132_s15  }
   0xa   : > { %p72_p0 = scmp.ne.s32.totalorder %s4298_s17, %s4294_s16  ;;  %p73_p1 = scmp.eq.s32.totalorder %s4310_s20, 0 }
   0xb   : > { %p78_p2 = scmp.ne.s32.totalorder %s4294_s16, %s4290_s15  ;;  %p79_p3 = scmp.eq.s32.totalorder %s4376_s21, 0 }
   0xc   : > { %p4384_p4 = por %p73_p1, %p72_p0  ;;  %p2669_p5 = scmp.ge.s32.totalorder %s4310_s20, 1 }
   0xd   : > { %p4391_p6 = por %p79_p3, %p78_p2  ;;  %p157_p7 = scmp.lt.s32.totalorder %s4310_s20, 3 }
   0xe   : > { %s184_s27 = sshll.u32 %s5122_s2, 4  ;;  %s4312_s29 = smov [#allocation10]   ;;  %s185_s27 = int_to_ptr.hbm [resolvable:$true] %s184_s27 }
   0xf   : > { %p4399_p8 = pnand %p2669_p5, %p157_p7  ;;  %s186_s30 = sshll.u32 %s4312_s29, 4  ;;  %s187_s30 = int_to_ptr.vmem [resolvable:$true] %s186_s30 }
  0x10   : > { %p4009_p10 = scmp.lt.s32.totalorder %s4310_s20, 2  ;;  %s5131_s0 = sld [smem:[#allocation19_spill]] }
  0x11   : > { %p3992_p9 = pneg %p4399_p8  ;;  %s196_s12 = sshll.u32 %s5123_s3, 4  ;;  %s197_s12 = int_to_ptr.hbm [resolvable:$true] %s196_s12 }
  0x12   : > { %p4414_p12 = pnand %p4009_p10, %p4384_p4  ;;  %s4313_s13 = smov [#allocation5]  }
  0x13   : > { %p4408_p11 = pnand %p3992_p9, %p79_p3  ;;  %s174_s14 = sshll.u32 %s4313_s13, 4  ;;  %s175_s14 = int_to_ptr.vmem [resolvable:$true] %s174_s14 }
  0x14   : > { %s4314_s15 = smov [#allocation11]   ;;  %s29_s25 = sadd.s32 1, %s4306_s19 }
  0x15   : > { %3998 = dma.hbm_to_vmem [thread:$0]  (!%p4408_p11), %s185_s27, 16, %s187_s30, [#allocation9]  }
  0x16   : > { %s172_s9 = sshll.u32 %s5131_s0, 4  ;;  %s198_s23 = sshll.u32 %s4314_s15, 4  ;;  %s173_s9 = int_to_ptr.hbm [resolvable:$true] %s172_s9  ;;  %s199_s23 = int_to_ptr.vmem [resolvable:$true] %s198_s23 }
  0x17   : > { %3995 = dma.hbm_to_vmem [thread:$0]  (!%p4408_p11), %s173_s9, 256, %s175_s14, [#allocation6]  }
  0x18   : > { %4001 = dma.hbm_to_vmem [thread:$0]  (!%p4408_p11), %s197_s12, 16, %s199_s23, [#allocation12]  }
  0x19   : > { %s209_s26 = sand.u32 1, %s4310_s20   ;;  %p30_p13 = scmp.ge.s32.totalorder %s29_s25, 2 }
  0x1a   : > { %s211_s27 = sand.u32 1, %s4298_s17   ;;  %s3716_s29 = sshll.u32 %s4306_s19, 4 }
  0x1b   : > { %s5138_s25 = smov (%p30_p13, %s29_s25), 0  ;;  %s2674_s30 = sshll.u32 %s211_s27, 11 }
  0x1c   : > { %s218_s9 = scalar_lea.hbm %s5121_s1, %s3716_s29  ;;  %s62_s10 = ssub.s32 %s4306_s19, %s5138_s25 }
  0x1d   : > { %p63_p0 = scmp.eq.s32.totalorder %s62_s10, 0  ;;  %s219_s5 = sshll.u32 %s218_s9, 4  ;;  %s220_s5 = int_to_ptr.hbm [resolvable:$true] %s219_s5 }
  0x1e   : > { %s213_s11 = scalar_lea.vmem [#allocation8], %s2674_s30  ;;  %s210_s14 = scalar_lea.sflag [#allocation9], %s209_s26 }
  0x1f   : > { %s221_s12 = sshll.u32 %s213_s11, 4  ;;  %s4315_s15 = smov 512   ;;  %s222_s12 = int_to_ptr.vmem [resolvable:$true] %s221_s12 }
  0x20   : > { %s4444_s13 = scalar_select %p63_p0, %s4298_s17, %s65_s22  }
  0x21   : > { %s4316_s23 = smov 256   ;;  %s4317_s0 = smov 16  }
  0x22   : > { %4005 = dma.hbm_to_vmem [thread:$0]  (!%p4414_p12), %s220_s5, 32768, %s222_s12, %s210_s14, %s4315_s15, %s4316_s23, %s4317_s0  }
  0x23   : > { %233 = sbr.rel (%p4399_p8) target bundleno = 1382 (0x566), region = 36 }
  0x28   : > { %4269 = dma.done.wait (%p79_p3), [#allocation6], 256  }
  0x29   : > { %4271 = vsyncadd (%p79_p3), [#allocation6], 4294967040  ;;  %s240_s22 = sand.u32 1, %s4376_s21   ;;  %s242_s27 = sand.u32 1, %s4294_s16  }
  0x2a   : > { %s2679_s26 = sshll.u32 %s242_s27, 11  ;;  %s241_s29 = scalar_lea.sflag [#allocation9], %s240_s22 }
  0x2b   : > { %s4456_s30 = scalar_lea.vmem [#allocation8], %s2679_s26 }
  0x2c   : > { %4273 = dma.done.wait (%p4391_p6), %s241_s29, 32768  }
  0x2d   : > { %4275 = vsyncadd (%p4391_p6), %s241_s29, 4294934528 }
  0x2e   : > { %4277 = dma.done.wait (%p79_p3), [#allocation9], 16  }
  0x2f   : > { %4279 = vsyncadd (%p79_p3), [#allocation9], 4294967280 }
  0x30   : > { %4281 = dma.done.wait (%p79_p3), [#allocation12], 16  }
  0x31   : > { %4283 = vsyncadd (%p79_p3), [#allocation12], 4294967280  ;;  %p2682_p1 = scmp.ne.s32.totalorder %s4302_s18, 0 }
  0x33   : > { %279 = sbr.rel (%p2682_p1) target bundleno = 455 (0x1c7), region = 56 }
  0x38   : > { %v280_v0 = vld [vmem:[#allocation5] sm:$0xff]  ;;  %v281_v1 = vld [vmem:[#allocation5 + $0x8] sm:$0xff]  ;;  %vm319_vm6 = vcmask 1041408   ;;  %v4318_v41 = vmov 269488144   ;;  %vm512_vm15 = vcmask 1024  }
  0x39   : > { %vm282_vm0 = vcmp.ne.f32.partialorder %v280_v0, %v280_v0  ;;  %vm283_vm1 = vcmp.ne.f32.partialorder %v281_v1, %v281_v1  ;;  %v4487_v42 = vunpack.c.l.s4 %v4318_v41 }
  0x3a   : > { %v284_v2 = vsel %vm282_vm0, 0.0, %v280_v0  ;;  %v285_v3 = vsel %vm283_vm1, 0.0, %v281_v1 }
  0x3b   : > { %vm286_vm2 = vcmp.eq.f32.partialorder %v284_v2, inf  ;;  %vm287_vm3 = vcmp.eq.f32.partialorder %v285_v3, inf  ;;  %v353_v46 = vunpack.c.0.s8 %v4487_v42 }
  0x3c   : > { %v288_v4 = vsel %vm286_vm2, 1.0, %v284_v2  ;;  %v289_v5 = vsel %vm287_vm3, 1.0, %v285_v3 }
  0x3d   : > { %vm290_vm4 = vcmp.eq.f32.partialorder %v288_v4, -inf  ;;  %vm291_vm5 = vcmp.eq.f32.partialorder %v289_v5, -inf }
  0x3e   : > { %v292_v6 = vsel %vm290_vm4, -1.0, %v288_v4  ;;  %v293_v7 = vsel %vm291_vm5, -1.0, %v289_v5  ;;  %vm486_vm4 = vcmask 1040384   ;;  %vm490_vm5 = vcmask 1042434  }
  0x3f   : > { %v4471_v8 = vadd.f32 1e-08, %v292_v6  ;;  %v4473_v9 = vadd.f32 1e-08, %v293_v7 }
  0x41   : > { %v296_v10 = vmul.f32 %v4471_v8, %v4471_v8  ;;  %v297_v11 = vmul.f32 %v4473_v9, %v4473_v9 }
  0x43   : > { %300 = vst [vmem:[#allocation1] ss:$4 sm:$0xff] %v296_v10 }
  0x44   : > { %302 = vst [vmem:[#allocation1 + $0x20] ss:$4 sm:$0xff] %v297_v11 }
  0x4a   : > { %v303_v12 = vld.sshfl [vmem:[#allocation1] sm:$0xff pattern:$0x73625140]  ;;  %v304_v13 = vld.sshfl [vmem:[#allocation1 + $0x8] sm:$0xff pattern:$0x73625140] }
  0x4b   : > { %v305_v14 = vld.sshfl [vmem:[#allocation1 + $0x10] sm:$0xff pattern:$0x73625140]  ;;  %v306_v15 = vld.sshfl [vmem:[#allocation1 + $0x18] sm:$0xff pattern:$0x73625140] }
  0x4c   : > { %v320_v16 = vsel %vm319_vm6, %v303_v12, 0.0  ;;  %v321_v17 = vsel %vm319_vm6, %v304_v13, 0.0  ;;  %v323_v18 = vsel %vm319_vm6, %v305_v14, 0.0  ;;  %v307_v19 = vld.sshfl [vmem:[#allocation1 + $0x20] sm:$0xff pattern:$0x73625140] }
  0x4d   : > { %v322_v20 = vadd.f32 %v321_v17, %v320_v16  ;;  %v325_v21 = vsel %vm319_vm6, %v306_v15, 0.0  ;;  %v308_v22 = vld.sshfl [vmem:[#allocation1 + $0x28] sm:$0xff pattern:$0x73625140]  ;;  %v327_v24 = vsel %vm319_vm6, %v307_v19, 0.0 }
  0x4e   : > { %v309_v25 = vld.sshfl [vmem:[#allocation1 + $0x30] sm:$0xff pattern:$0x73625140]  ;;  %v329_v27 = vsel %vm319_vm6, %v308_v22, 0.0 }
  0x4f   : > { %v324_v23 = vadd.f32 %v323_v18, %v322_v20  ;;  %v310_v28 = vld.sshfl [vmem:[#allocation1 + $0x38] sm:$0xff pattern:$0x73625140]  ;;  %v331_v30 = vsel %vm319_vm6, %v309_v25, 0.0 }
  0x50   : > { %v333_v32 = vsel %vm319_vm6, %v310_v28, 0.0 }
  0x51   : > { %v326_v26 = vadd.f32 %v325_v21, %v324_v23 }
  0x53   : > { %v328_v29 = vadd.f32 %v327_v24, %v326_v26 }
  0x55   : > { %v330_v31 = vadd.f32 %v329_v27, %v328_v29 }
  0x57   : > { %v332_v33 = vadd.f32 %v331_v30, %v330_v31 }
  0x59   : > { %v334_v34 = vadd.f32 %v333_v32, %v332_v33 }
  0x5b   : > { %335 = vadd.xlane.f32.xlu0 %v334_v34 }
  0xce   : > { %v336_v35 = vpop.xlane.xlu0 %335 }
  0xcf   : > { %4073 = vrsqrt.f32 %v336_v35  ;;  %vm344_vm7 = vcmp.eq.f32.partialorder %v336_v35, inf  ;;  %v347_v45 = vand.u32 2147483648, %v336_v35  ;;  %vm346_vm8 = vcmp.eq.f32.partialorder %v336_v35, 0.0 }
  0xd5   : > { %v4074_v36 = vpop.eup %4073 }
  0xd6   : > { %v338_v37 = vmul.f32 %v4074_v36, %v336_v35 }
  0xd8   : > { %v339_v38 = vmul.f32 %v4074_v36, %v338_v37 }
  0xda   : > { %v340_v39 = vmul.f32 0.5, %v339_v38  ;;  %v4319_v38 = vmov 0.0  }
  0xdb   : > { %513 = vst.msk [vmem:[#allocation4] sm:$0x3] %vm512_vm15, %v4319_v38 }
  0xdc   : > { %v341_v40 = vsub.f32 1.5, %v340_v39 }
  0xde   : > { %v342_v43 = vmul.f32 %v4074_v36, %v341_v40 }
  0xe0   : > { %v343_v44 = vmul.f32 %v342_v43, %v336_v35 }
  0xe2   : > { %v345_v47 = vsel %vm344_vm7, %v336_v35, %v343_v44  ;;  %vm495_vm7 = vcmask 1044484  }
  0xe3   : > { %v348_v48 = vsel %vm346_vm8, %v347_v45, %v345_v47  ;;  %vm499_vm8 = vcmask 1046534  }
  0xe4   : > { %v349_v49 = vmax.f32 %v348_v48, 1e-12 }
  0xe6   : > { %v354_v50 = vperm.slane %v349_v49, %v353_v46 }
  0xe8   : > { %4075 = vrcp.f32 %v354_v50  ;;  %v367_v54 = vand.u32 2147483648, %v354_v50  ;;  %v365_v56 = vand.u32 2147483647, %v354_v50  ;;  %vm361_vm10 = vweird.f32 %v354_v50 }
  0xea   : > { %v368_v58 = vor.u32 1.1754944e-38, %v367_v54  ;;  %vm366_vm12 = vcmp.eq.f32.partialorder %v365_v56, 8.507059e+37 }
  0xee   : > { %v4076_v51 = vpop.eup %4075 }
  0xef   : > { %v357_v52 = vmul.f32 %v4076_v51, %v354_v50  ;;  %vm362_vm9 = vweird.f32 %v4076_v51 }
  0xf0   : > { %vm363_vm11 = vmor %vm361_vm10, %vm362_vm9  ;;  %vm503_vm9 = vcmask 1045508   ;;  %vm505_vm10 = vcmask 1043456  }
  0xf1   : > { %v358_v53 = vsub.f32 1.0, %v357_v52 }
  0xf3   : > { %v359_v55 = vmul.f32 %v4076_v51, %v358_v53 }
  0xf5   : > { %v360_v57 = vadd.f32 %v4076_v51, %v359_v55 }
  0xf7   : > { %v364_v59 = vsel %vm363_vm11, %v4076_v51, %v360_v57 }
  0xf8   : > { %v369_v60 = vsel %vm366_vm12, %v368_v58, %v364_v59 }
  0xf9   : > { %v370_v61 = vmul.f32 %v369_v60, %v4471_v8  ;;  %v371_v62 = vmul.f32 %v369_v60, %v4473_v9 }
  0xfb   : > { %v4494_v63 = vclamps-f32 %v370_v61, 1.0  ;;  %v4496_v0 = vclamps-f32 %v371_v62, 1.0 }
  0xfd   : > { %v376_v1 = vmul.f32 %v4494_v63, %v4494_v63  ;;  %v377_v2 = vmul.f32 %v4496_v0, %v4496_v0 }
  0xff   : > { %380 = vst [vmem:[#allocation1] ss:$4 sm:$0xff] %v376_v1 }
 0x100   : > { %382 = vst [vmem:[#allocation1 + $0x20] ss:$4 sm:$0xff] %v377_v2 }
 0x106   : > { %v383_v3 = vld.sshfl [vmem:[#allocation1] sm:$0xff pattern:$0x73625140]  ;;  %v384_v4 = vld.sshfl [vmem:[#allocation1 + $0x8] sm:$0xff pattern:$0x73625140] }
 0x107   : > { %v385_v5 = vld.sshfl [vmem:[#allocation1 + $0x10] sm:$0xff pattern:$0x73625140]  ;;  %v399_v6 = vsel %vm319_vm6, %v383_v3, 0.0  ;;  %v400_v7 = vsel %vm319_vm6, %v384_v4, 0.0 }
 0x108   : > { %v386_v8 = vld.sshfl [vmem:[#allocation1 + $0x18] sm:$0xff pattern:$0x73625140]  ;;  %v401_v9 = vadd.f32 %v400_v7, %v399_v6  ;;  %v402_v10 = vsel %vm319_vm6, %v385_v5, 0.0 }
 0x109   : > { %v387_v11 = vld.sshfl [vmem:[#allocation1 + $0x20] sm:$0xff pattern:$0x73625140]  ;;  %v404_v13 = vsel %vm319_vm6, %v386_v8, 0.0 }
 0x10a   : > { %v403_v12 = vadd.f32 %v402_v10, %v401_v9  ;;  %v388_v14 = vld.sshfl [vmem:[#allocation1 + $0x28] sm:$0xff pattern:$0x73625140]  ;;  %v406_v16 = vsel %vm319_vm6, %v387_v11, 0.0 }
 0x10b   : > { %v389_v17 = vld.sshfl [vmem:[#allocation1 + $0x30] sm:$0xff pattern:$0x73625140]  ;;  %v408_v19 = vsel %vm319_vm6, %v388_v14, 0.0 }
 0x10c   : > { %v405_v15 = vadd.f32 %v404_v13, %v403_v12  ;;  %v390_v20 = vld.sshfl [vmem:[#allocation1 + $0x38] sm:$0xff pattern:$0x73625140]  ;;  %v410_v22 = vsel %vm319_vm6, %v389_v17, 0.0 }
 0x10d   : > { %v412_v24 = vsel %vm319_vm6, %v390_v20, 0.0 }
 0x10e   : > { %v407_v18 = vadd.f32 %v406_v16, %v405_v15 }
 0x110   : > { %v409_v21 = vadd.f32 %v408_v19, %v407_v18 }
 0x112   : > { %v411_v23 = vadd.f32 %v410_v22, %v409_v21 }
 0x114   : > { %v413_v25 = vadd.f32 %v412_v24, %v411_v23 }
 0x116   : > { %414 = vadd.xlane.f32.xlu0 %v413_v25 }
 0x189   : > { %v415_v26 = vpop.xlane.xlu0 %414 }
 0x18a   : > { %4077 = vrsqrt.f32 %v415_v26  ;;  %vm423_vm13 = vcmp.eq.f32.partialorder %v415_v26, inf  ;;  %v426_v34 = vand.u32 2147483648, %v415_v26  ;;  %vm425_vm14 = vcmp.eq.f32.partialorder %v415_v26, 0.0 }
 0x190   : > { %v4078_v27 = vpop.eup %4077 }
 0x191   : > { %v417_v28 = vmul.f32 %v4078_v27, %v415_v26 }
 0x193   : > { %v418_v29 = vmul.f32 %v4078_v27, %v417_v28 }
 0x195   : > { %v419_v30 = vmul.f32 0.5, %v418_v29 }
 0x197   : > { %v420_v31 = vsub.f32 1.5, %v419_v30 }
 0x199   : > { %v421_v32 = vmul.f32 %v4078_v27, %v420_v31 }
 0x19b   : > { %v422_v33 = vmul.f32 %v421_v32, %v415_v26 }
 0x19d   : > { %v424_v35 = vsel %vm423_vm13, %v415_v26, %v422_v33 }
 0x19e   : > { %v427_v36 = vsel %vm425_vm14, %v426_v34, %v424_v35 }
 0x19f   : > { %v432_v37 = vperm.slane %v427_v36, %v353_v46 }
 0x1a1   : > { %4079 = vrcp.f32 %v432_v37  ;;  %v445_v43 = vand.u32 2147483648, %v432_v37  ;;  %v443_v45 = vand.u32 2147483647, %v432_v37  ;;  %vm439_vm1 = vweird.f32 %v432_v37 }
 0x1a3   : > { %v446_v48 = vor.u32 1.1754944e-38, %v445_v43  ;;  %vm444_vm3 = vcmp.eq.f32.partialorder %v443_v45, 8.507059e+37 }
 0x1a7   : > { %v4080_v39 = vpop.eup %4079 }
 0x1a8   : > { %v435_v40 = vmul.f32 %v4080_v39, %v432_v37  ;;  %vm440_vm0 = vweird.f32 %v4080_v39 }
 0x1a9   : > { %vm441_vm2 = vmor %vm439_vm1, %vm440_vm0 }
 0x1aa   : > { %v436_v41 = vsub.f32 1.0, %v435_v40 }
 0x1ac   : > { %v437_v44 = vmul.f32 %v4080_v39, %v436_v41 }
 0x1ae   : > { %v438_v47 = vadd.f32 %v4080_v39, %v437_v44 }
 0x1b0   : > { %v442_v49 = vsel %vm441_vm2, %v4080_v39, %v438_v47 }
 0x1b1   : > { %v447_v50 = vsel %vm444_vm3, %v446_v48, %v442_v49 }
 0x1b2   : > { %v448_v42 = vmul.f32 %v4494_v63, %v447_v50  ;;  %v449_v46 = vmul.f32 %v4496_v0, %v447_v50 }
 0x1b4   : > { %452 = vst [vmem:[#allocation1] ss:$4 sm:$0xff] %v448_v42 }
 0x1b5   : > { %454 = vst [vmem:[#allocation1 + $0x20] ss:$4 sm:$0xff] %v449_v46 }
 0x1b6   : > { %509 = vst [vmem:[#allocation2] sm:$0xff] %v448_v42 }
 0x1b7   : > { %511 = vst [vmem:[#allocation2 + $0x8] sm:$0xff] %v449_v46 }
 0x1bb   : > { %v455_v51 = vld.sshfl [vmem:[#allocation1] sm:$0xff pattern:$0x73625140]  ;;  %v456_v52 = vld.sshfl [vmem:[#allocation1 + $0x8] sm:$0xff pattern:$0x73625140] }
 0x1bc   : > { %v457_v53 = vld.sshfl [vmem:[#allocation1 + $0x10] sm:$0xff pattern:$0x73625140]  ;;  %v458_v54 = vld.sshfl [vmem:[#allocation1 + $0x18] sm:$0xff pattern:$0x73625140]  ;;  %v471_v55 = vpack.c.bf16 %v456_v52, %v455_v51 }
 0x1bd   : > { %v459_v56 = vld.sshfl [vmem:[#allocation1 + $0x20] sm:$0xff pattern:$0x73625140]  ;;  %v460_v57 = vld.sshfl [vmem:[#allocation1 + $0x28] sm:$0xff pattern:$0x73625140]  ;;  %v472_v58 = vpack.c.bf16 %v458_v54, %v457_v53 }
 0x1be   : > { %v461_v59 = vld.sshfl [vmem:[#allocation1 + $0x30] sm:$0xff pattern:$0x73625140]  ;;  %v462_v60 = vld.sshfl [vmem:[#allocation1 + $0x38] sm:$0xff pattern:$0x73625140]  ;;  %v473_v61 = vpack.c.bf16 %v460_v57, %v459_v56 }
 0x1bf   : > { %v474_v62 = vpack.c.bf16 %v462_v60, %v461_v59  ;;  %v479_v63 = vrot.slane %v471_v55, 3  ;;  %v480_v0 = vrot.slane %v472_v58, 6  ;;  %v481_v1 = vrot.slane %v472_v58, 1 }
 0x1c0   : > { %v482_v2 = vrot.slane %v473_v61, 4  ;;  %v483_v3 = vrot.slane %v473_v61, 7 }
 0x1c1   : > { %v484_v4 = vrot.slane %v474_v62, 2  ;;  %v485_v5 = vrot.slane %v474_v62, 5  ;;  %v489_v6 = vsel %vm486_vm4, %v471_v55, %v479_v63  ;;  %v493_v7 = vsel %vm490_vm5, %v480_v0, %v481_v1 }
 0x1c2   : > { %v494_v8 = vsel %vm319_vm6, %v489_v6, %v493_v7  ;;  %v498_v9 = vsel %vm495_vm7, %v482_v2, %v483_v3 }
 0x1c3   : > { %v502_v10 = vsel %vm499_vm8, %v484_v4, %v485_v5 }
 0x1c4   : > { %v504_v11 = vsel %vm503_vm9, %v498_v9, %v502_v10 }
 0x1c5   : > { %v506_v12 = vsel %vm505_vm10, %v494_v8, %v504_v11 }
 0x1c6   : > { %508 = vst [vmem:[#allocation3] sm:$0xff] %v506_v12 }
 0x1c7 PF: > { %v2799_v13 = vld [vmem:[%s4456_s30 + $0xe0] sm:$0xf]  ;;  %v3747_v14 = vld [vmem:[%s4456_s30 + $0xec] sm:$0xf0]  ;;  %vm2497_vm6 = vcmask 1041408   ;;  %s3973_s0 = sshll.u32 %s4302_s18, 3 }
 0x1c8   : > { %v2927_v15 = vld [vmem:[%s4456_s30 + $0x1e0] sm:$0xf]  ;;  %v2800_v16 = vor.u32 %v3747_v14, %v2799_v13  ;;  %v3779_v17 = vld [vmem:[%s4456_s30 + $0x1ec] sm:$0xf0]  ;;  %vm2499_vm11 = vcmask 1045508   ;;  %vm2501_vm12 = vcmask 1043456  }
 0x1c9   : > { %v3055_v18 = vld [vmem:[%s4456_s30 + $0x2e0] sm:$0xf]  ;;  %v3811_v19 = vld [vmem:[%s4456_s30 + $0x2ec] sm:$0xf0]  ;;  %v2928_v20 = vor.u32 %v3779_v17, %v2927_v15  ;;  %s2488_s24 = scalar_lea.vmem [#allocation2], %s3973_s0  ;;  %vm2525_vm13 = vcmask 1024  }
 0x1ca   : > { %v3056_v21 = vor.u32 %v3811_v19, %v3055_v18  ;;  %v3183_v22 = vld [vmem:[%s4456_s30 + $0x3e0] sm:$0xf]  ;;  %v3843_v23 = vld [vmem:[%s4456_s30 + $0x3ec] sm:$0xf0]  ;;  %2069 = vmatpush.bf16.msra.mxu0 %v2800_v16  ;;  %p3711_p2 = scmp.ne.s32.totalorder %s4302_s18, 1 }
 0x1cb   : > { %v2783_v24 = vld [vmem:[%s4456_s30 + $0xc0] sm:$0xf]  ;;  %v3184_v25 = vor.u32 %v3843_v23, %v3183_v22  ;;  %v3743_v26 = vld [vmem:[%s4456_s30 + $0xcc] sm:$0xf0]  ;;  %2082 = vmatpush.bf16.msra.mxu1 %v2928_v20 }
 0x1cc   : > { %v2911_v27 = vld [vmem:[%s4456_s30 + $0x1c0] sm:$0xf]  ;;  %v3775_v28 = vld [vmem:[%s4456_s30 + $0x1cc] sm:$0xf0]  ;;  %2095 = vmatpush.bf16.msra.mxu2 %v3056_v21  ;;  %v2784_v29 = vor.u32 %v3743_v26, %v2783_v24 }
 0x1cd   : > { %v2912_v30 = vor.u32 %v3775_v28, %v2911_v27  ;;  %v3039_v31 = vld [vmem:[%s4456_s30 + $0x2c0] sm:$0xf]  ;;  %v3807_v32 = vld [vmem:[%s4456_s30 + $0x2cc] sm:$0xf0]  ;;  %2108 = vmatpush.bf16.msra.mxu3 %v3184_v25 }
 0x1ce   : > { %v3167_v33 = vld [vmem:[%s4456_s30 + $0x3c0] sm:$0xf]  ;;  %v3040_v34 = vor.u32 %v3807_v32, %v3039_v31  ;;  %v3839_v35 = vld [vmem:[%s4456_s30 + $0x3cc] sm:$0xf0]  ;;  %2070 = vmatpush.bf16.msra.mxu0 %v2784_v29 }
 0x1cf   : > { %v2767_v36 = vld [vmem:[%s4456_s30 + $0xa0] sm:$0xf]  ;;  %v3739_v37 = vld [vmem:[%s4456_s30 + $0xac] sm:$0xf0]  ;;  %v3168_v38 = vor.u32 %v3839_v35, %v3167_v33  ;;  %2083 = vmatpush.bf16.msra.mxu1 %v2912_v30 }
 0x1d0   : > { %v2895_v39 = vld [vmem:[%s4456_s30 + $0x1a0] sm:$0xf]  ;;  %v3771_v40 = vld [vmem:[%s4456_s30 + $0x1ac] sm:$0xf0]  ;;  %v2768_v43 = vor.u32 %v3739_v37, %v2767_v36  ;;  %2096 = vmatpush.bf16.msra.mxu2 %v3040_v34 }
 0x1d1   : > { %v3023_v41 = vld [vmem:[%s4456_s30 + $0x2a0] sm:$0xf]  ;;  %v3803_v44 = vld [vmem:[%s4456_s30 + $0x2ac] sm:$0xf0]  ;;  %v2896_v48 = vor.u32 %v3771_v40, %v2895_v39  ;;  %2109 = vmatpush.bf16.msra.mxu3 %v3168_v38 }
 0x1d2   : > { %v3151_v45 = vld [vmem:[%s4456_s30 + $0x3a0] sm:$0xf]  ;;  %v3835_v47 = vld [vmem:[%s4456_s30 + $0x3ac] sm:$0xf0]  ;;  %v3024_v49 = vor.u32 %v3803_v44, %v3023_v41  ;;  %2071 = vmatpush.bf16.msra.mxu0 %v2768_v43 }
 0x1d3   : > { %v2751_v50 = vld [vmem:[%s4456_s30 + $0x80] sm:$0xf]  ;;  %v3735_v42 = vld [vmem:[%s4456_s30 + $0x8c] sm:$0xf0]  ;;  %v3152_v51 = vor.u32 %v3835_v47, %v3151_v45  ;;  %2084 = vmatpush.bf16.msra.mxu1 %v2896_v48 }
 0x1d4   : > { %v2879_v46 = vld [vmem:[%s4456_s30 + $0x180] sm:$0xf]  ;;  %v3767_v52 = vld [vmem:[%s4456_s30 + $0x18c] sm:$0xf0]  ;;  %v2752_v57 = vor.u32 %v3735_v42, %v2751_v50  ;;  %2097 = vmatpush.bf16.msra.mxu2 %v3024_v49 }
 0x1d5   : > { %v3007_v53 = vld [vmem:[%s4456_s30 + $0x280] sm:$0xf]  ;;  %v3799_v54 = vld [vmem:[%s4456_s30 + $0x28c] sm:$0xf0]  ;;  %v2880_v58 = vor.u32 %v3767_v52, %v2879_v46  ;;  %2110 = vmatpush.bf16.msra.mxu3 %v3152_v51 }
 0x1d6   : > { %v3135_v55 = vld [vmem:[%s4456_s30 + $0x380] sm:$0xf]  ;;  %v3831_v56 = vld [vmem:[%s4456_s30 + $0x38c] sm:$0xf0]  ;;  %v3008_v59 = vor.u32 %v3799_v54, %v3007_v53  ;;  %2072 = vmatpush.bf16.msra.mxu0 %v2752_v57 }
 0x1d7   : > { %v2735_v60 = vld [vmem:[%s4456_s30 + $0x60] sm:$0xf]  ;;  %v3731_v61 = vld [vmem:[%s4456_s30 + $0x6c] sm:$0xf0]  ;;  %v3136_v63 = vor.u32 %v3831_v56, %v3135_v55  ;;  %2085 = vmatpush.bf16.msra.mxu1 %v2880_v58 }
 0x1d8   : > { %v2863_v62 = vld [vmem:[%s4456_s30 + $0x160] sm:$0xf]  ;;  %v3763_v0 = vld [vmem:[%s4456_s30 + $0x16c] sm:$0xf0]  ;;  %v2736_v5 = vor.u32 %v3731_v61, %v2735_v60  ;;  %2098 = vmatpush.bf16.msra.mxu2 %v3008_v59 }
 0x1d9   : > { %v2991_v1 = vld [vmem:[%s4456_s30 + $0x260] sm:$0xf]  ;;  %v3795_v2 = vld [vmem:[%s4456_s30 + $0x26c] sm:$0xf0]  ;;  %v2864_v6 = vor.u32 %v3763_v0, %v2863_v62  ;;  %2111 = vmatpush.bf16.msra.mxu3 %v3136_v63 }
 0x1da   : > { %v3119_v3 = vld [vmem:[%s4456_s30 + $0x360] sm:$0xf]  ;;  %v3827_v4 = vld [vmem:[%s4456_s30 + $0x36c] sm:$0xf0]  ;;  %v2992_v7 = vor.u32 %v3795_v2, %v2991_v1  ;;  %2073 = vmatpush.bf16.msra.mxu0 %v2736_v5 }
 0x1db   : > { %v2719_v8 = vld [vmem:[%s4456_s30 + $0x40] sm:$0xf]  ;;  %v3727_v9 = vld [vmem:[%s4456_s30 + $0x4c] sm:$0xf0]  ;;  %v3120_v11 = vor.u32 %v3827_v4, %v3119_v3  ;;  %2086 = vmatpush.bf16.msra.mxu1 %v2864_v6 }
 0x1dc   : > { %v2847_v10 = vld [vmem:[%s4456_s30 + $0x140] sm:$0xf]  ;;  %v3759_v12 = vld [vmem:[%s4456_s30 + $0x14c] sm:$0xf0]  ;;  %v2720_v17 = vor.u32 %v3727_v9, %v2719_v8  ;;  %2099 = vmatpush.bf16.msra.mxu2 %v2992_v7  ;;  %v514_v8 = vld [vmem:[#allocation3] sm:$0xff] }
 0x1dd   : > { %v2975_v13 = vld [vmem:[%s4456_s30 + $0x240] sm:$0xf]  ;;  %v3791_v14 = vld [vmem:[%s4456_s30 + $0x24c] sm:$0xf0]  ;;  %v2848_v18 = vor.u32 %v3759_v12, %v2847_v10  ;;  %2112 = vmatpush.bf16.msra.mxu3 %v3120_v11  ;;  %772 = vst [vmem:[#allocation1] ss:$9 sm:$0xff] %v514_v8 }
 0x1de   : > { %v3103_v15 = vld [vmem:[%s4456_s30 + $0x340] sm:$0xf]  ;;  %v3823_v16 = vld [vmem:[%s4456_s30 + $0x34c] sm:$0xf0]  ;;  %v2976_v19 = vor.u32 %v3791_v14, %v2975_v13  ;;  %2074 = vmatpush.bf16.msra.mxu0 %v2720_v17 }
 0x1df   : > { %v2703_v20 = vld [vmem:[%s4456_s30 + $0x20] sm:$0xf]  ;;  %v3723_v21 = vld [vmem:[%s4456_s30 + $0x2c] sm:$0xf0]  ;;  %v3104_v23 = vor.u32 %v3823_v16, %v3103_v15  ;;  %2087 = vmatpush.bf16.msra.mxu1 %v2848_v18 }
 0x1e0   : > { %v2831_v22 = vld [vmem:[%s4456_s30 + $0x120] sm:$0xf]  ;;  %v3755_v24 = vld [vmem:[%s4456_s30 + $0x12c] sm:$0xf0]  ;;  %v2704_v29 = vor.u32 %v3723_v21, %v2703_v20  ;;  %2100 = vmatpush.bf16.msra.mxu2 %v2976_v19 }
 0x1e1   : > { %v2959_v25 = vld [vmem:[%s4456_s30 + $0x220] sm:$0xf]  ;;  %v3787_v26 = vld [vmem:[%s4456_s30 + $0x22c] sm:$0xf0]  ;;  %v2832_v32 = vor.u32 %v3755_v24, %v2831_v22  ;;  %2113 = vmatpush.bf16.msra.mxu3 %v3104_v23 }
 0x1e2   : > { %v3087_v27 = vld [vmem:[%s4456_s30 + $0x320] sm:$0xf]  ;;  %v3819_v28 = vld [vmem:[%s4456_s30 + $0x32c] sm:$0xf0]  ;;  %v2960_v33 = vor.u32 %v3787_v26, %v2959_v25  ;;  %2075 = vmatpush.bf16.msra.mxu0 %v2704_v29 }
 0x1e3   : > { %v2687_v30 = vld [vmem:[%s4456_s30] sm:$0xf]  ;;  %v3719_v31 = vld [vmem:[%s4456_s30 + $0xc] sm:$0xf0]  ;;  %v3088_v37 = vor.u32 %v3819_v28, %v3087_v27  ;;  %2088 = vmatpush.bf16.msra.mxu1 %v2832_v32 }
 0x1e4   : > { %v2815_v34 = vld [vmem:[%s4456_s30 + $0x100] sm:$0xf]  ;;  %v3751_v35 = vld [vmem:[%s4456_s30 + $0x10c] sm:$0xf0]  ;;  %v2688_v45 = vor.u32 %v3719_v31, %v2687_v30  ;;  %2101 = vmatpush.bf16.msra.mxu2 %v2960_v33 }
 0x1e5   : > { %v2943_v36 = vld [vmem:[%s4456_s30 + $0x200] sm:$0xf]  ;;  %v3783_v38 = vld [vmem:[%s4456_s30 + $0x20c] sm:$0xf0]  ;;  %v2816_v50 = vor.u32 %v3751_v35, %v2815_v34  ;;  %2114 = vmatpush.bf16.msra.mxu3 %v3088_v37 }
 0x1e6   : > { %v3071_v39 = vld [vmem:[%s4456_s30 + $0x300] sm:$0xf]  ;;  %v3815_v40 = vld [vmem:[%s4456_s30 + $0x30c] sm:$0xf0]  ;;  %v2944_v42 = vor.u32 %v3783_v38, %v2943_v36  ;;  %2076 = vmatpush.bf16.msra.mxu0 %v2688_v45 }
 0x1e7   : > { %v3311_v41 = vld [vmem:[%s4456_s30 + $0x4e0] sm:$0xf]  ;;  %v3875_v43 = vld [vmem:[%s4456_s30 + $0x4ec] sm:$0xf0]  ;;  %v3072_v52 = vor.u32 %v3815_v40, %v3071_v39  ;;  %2089 = vmatpush.bf16.msra.mxu1 %v2816_v50  ;;  %v4627_v39 = vld [vmem:[#allocation1 + $0x9] sm:$0xff] }
 0x1e8   : > { %v3439_v44 = vld [vmem:[%s4456_s30 + $0x5e0] sm:$0xf]  ;;  %v3907_v47 = vld [vmem:[%s4456_s30 + $0x5ec] sm:$0xf0]  ;;  %v3312_v53 = vor.u32 %v3875_v43, %v3311_v41  ;;  %2102 = vmatpush.bf16.msra.mxu2 %v2944_v42 }
 0x1e9   : > { %v3567_v48 = vld [vmem:[%s4456_s30 + $0x6e0] sm:$0xf]  ;;  %v3939_v49 = vld [vmem:[%s4456_s30 + $0x6ec] sm:$0xf0]  ;;  %v3440_v54 = vor.u32 %v3907_v47, %v3439_v44  ;;  %2115 = vmatpush.bf16.msra.mxu3 %v3072_v52 }
 0x1ea   : > { %v3695_v46 = vld [vmem:[%s4456_s30 + $0x7e0] sm:$0xf]  ;;  %v3971_v51 = vld [vmem:[%s4456_s30 + $0x7ec] sm:$0xf0]  ;;  %v3568_v55 = vor.u32 %v3939_v49, %v3567_v48  ;;  %2121 = vmatpush.bf16.msrb.mxu0 %v3312_v53  ;;  %2090 = vmatmul.bf16.vlgmr.msra.gmra.mxu1 %v4627_v39 }
 0x1eb   : > { %v3295_v56 = vld [vmem:[%s4456_s30 + $0x4c0] sm:$0xf]  ;;  %v3871_v57 = vld [vmem:[%s4456_s30 + $0x4cc] sm:$0xf0]  ;;  %v3696_v59 = vor.u32 %v3971_v51, %v3695_v46  ;;  %2134 = vmatpush.bf16.msrb.mxu1 %v3440_v54 }
 0x1ec   : > { %v3423_v58 = vld [vmem:[%s4456_s30 + $0x5c0] sm:$0xf]  ;;  %v3903_v60 = vld [vmem:[%s4456_s30 + $0x5cc] sm:$0xf0]  ;;  %v3296_v1 = vor.u32 %v3871_v57, %v3295_v56  ;;  %2147 = vmatpush.bf16.msrb.mxu2 %v3568_v55 }
 0x1ed   : > { %v3551_v61 = vld [vmem:[%s4456_s30 + $0x6c0] sm:$0xf]  ;;  %v3935_v62 = vld [vmem:[%s4456_s30 + $0x6cc] sm:$0xf0]  ;;  %v3424_v4 = vor.u32 %v3903_v60, %v3423_v58  ;;  %2160 = vmatpush.bf16.msrb.mxu3 %v3696_v59 }
 0x1ee   : > { %v3679_v63 = vld [vmem:[%s4456_s30 + $0x7c0] sm:$0xf]  ;;  %v3967_v0 = vld [vmem:[%s4456_s30 + $0x7cc] sm:$0xf0]  ;;  %v3552_v5 = vor.u32 %v3935_v62, %v3551_v61  ;;  %2122 = vmatpush.bf16.msrb.mxu0 %v3296_v1 }
 0x1ef   : > { %v3279_v2 = vld [vmem:[%s4456_s30 + $0x4a0] sm:$0xf]  ;;  %v3867_v3 = vld [vmem:[%s4456_s30 + $0x4ac] sm:$0xf0]  ;;  %v3680_v9 = vor.u32 %v3967_v0, %v3679_v63  ;;  %2135 = vmatpush.bf16.msrb.mxu1 %v3424_v4 }
 0x1f0   : > { %v3407_v6 = vld [vmem:[%s4456_s30 + $0x5a0] sm:$0xf]  ;;  %v3899_v7 = vld [vmem:[%s4456_s30 + $0x5ac] sm:$0xf0]  ;;  %v3280_v14 = vor.u32 %v3867_v3, %v3279_v2  ;;  %2148 = vmatpush.bf16.msrb.mxu2 %v3552_v5 }
 0x1f1   : > { %v3535_v10 = vld [vmem:[%s4456_s30 + $0x6a0] sm:$0xf]  ;;  %v3931_v11 = vld [vmem:[%s4456_s30 + $0x6ac] sm:$0xf0]  ;;  %v3408_v15 = vor.u32 %v3899_v7, %v3407_v6  ;;  %2161 = vmatpush.bf16.msrb.mxu3 %v3680_v9 }
 0x1f2   : > { %v3663_v12 = vld [vmem:[%s4456_s30 + $0x7a0] sm:$0xf]  ;;  %v3963_v13 = vld [vmem:[%s4456_s30 + $0x7ac] sm:$0xf0]  ;;  %v3536_v16 = vor.u32 %v3931_v11, %v3535_v10  ;;  %2123 = vmatpush.bf16.msrb.mxu0 %v3280_v14  ;;  %v3745_v14 = vld [vmem:[%s4456_s30 + $0xe4] sm:$0xf] }
 0x1f3   : > { %v3263_v17 = vld [vmem:[%s4456_s30 + $0x480] sm:$0xf]  ;;  %v3863_v18 = vld [vmem:[%s4456_s30 + $0x48c] sm:$0xf0]  ;;  %v3664_v20 = vor.u32 %v3963_v13, %v3663_v12  ;;  %2136 = vmatpush.bf16.msrb.mxu1 %v3408_v15  ;;  %v2801_v15 = vld [vmem:[%s4456_s30 + $0xf0] sm:$0xf0] }
 0x1f4   : > { %v3391_v19 = vld [vmem:[%s4456_s30 + $0x580] sm:$0xf]  ;;  %v3895_v21 = vld [vmem:[%s4456_s30 + $0x58c] sm:$0xf0]  ;;  %v3264_v27 = vor.u32 %v3863_v18, %v3263_v17  ;;  %2149 = vmatpush.bf16.msrb.mxu2 %v3536_v16  ;;  %v3777_v16 = vld [vmem:[%s4456_s30 + $0x1e4] sm:$0xf] }
 0x1f5   : > { %v3519_v22 = vld [vmem:[%s4456_s30 + $0x680] sm:$0xf]  ;;  %v3927_v23 = vld [vmem:[%s4456_s30 + $0x68c] sm:$0xf0]  ;;  %v3392_v31 = vor.u32 %v3895_v21, %v3391_v19  ;;  %2162 = vmatpush.bf16.msrb.mxu3 %v3664_v20  ;;  %v2929_v18 = vld [vmem:[%s4456_s30 + $0x1f0] sm:$0xf0] }
 0x1f6   : > { %v3647_v24 = vld [vmem:[%s4456_s30 + $0x780] sm:$0xf]  ;;  %v3959_v25 = vld [vmem:[%s4456_s30 + $0x78c] sm:$0xf0]  ;;  %v3520_v32 = vor.u32 %v3927_v23, %v3519_v22  ;;  %2124 = vmatpush.bf16.msrb.mxu0 %v3264_v27  ;;  %v3809_v19 = vld [vmem:[%s4456_s30 + $0x2e4] sm:$0xf]  ;;  %v2932_v27 = vor.u32 %v3777_v16, %v2929_v18 }
 0x1f7   : > { %v3247_v26 = vld [vmem:[%s4456_s30 + $0x460] sm:$0xf]  ;;  %v3859_v28 = vld [vmem:[%s4456_s30 + $0x46c] sm:$0xf0]  ;;  %v3648_v36 = vor.u32 %v3959_v25, %v3647_v24  ;;  %2137 = vmatpush.bf16.msrb.mxu1 %v3392_v31  ;;  %v3057_v20 = vld [vmem:[%s4456_s30 + $0x2f0] sm:$0xf0] }
 0x1f8   : > { %v3375_v29 = vld [vmem:[%s4456_s30 + $0x560] sm:$0xf]  ;;  %v3891_v30 = vld [vmem:[%s4456_s30 + $0x56c] sm:$0xf0]  ;;  %v3248_v43 = vor.u32 %v3859_v28, %v3247_v26  ;;  %2150 = vmatpush.bf16.msrb.mxu2 %v3520_v32  ;;  %v3841_v23 = vld [vmem:[%s4456_s30 + $0x3e4] sm:$0xf]  ;;  %v2804_v26 = vor.u32 %v3745_v14, %v2801_v15  ;;  %v3060_v28 = vor.u32 %v3809_v19, %v3057_v20 }
 0x1f9   : > { %v4618_v33 = vld [vmem:[#allocation1 + $0x12] sm:$0xff]  ;;  %v4620_v34 = vld [vmem:[#allocation1] sm:$0xff]  ;;  %v3376_v44 = vor.u32 %v3891_v30, %v3375_v29  ;;  %2163 = vmatpush.bf16.msrb.mxu3 %v3648_v36 }
 0x1fa   : > { %v4622_v35 = vld [vmem:[#allocation1 + $0x1b] sm:$0xff]  ;;  %v3503_v37 = vld [vmem:[%s4456_s30 + $0x660] sm:$0xf]  ;;  %2103 = vmatmul.bf16.vlgmr.msra.gmra.mxu2 %v4618_v33  ;;  %2077 = vmatmul.bf16.vlgmr.msra.gmra.mxu0 %v4620_v34  ;;  %v3185_v24 = vld [vmem:[%s4456_s30 + $0x3f0] sm:$0xf0] }
 0x1fb   : > { %v3923_v38 = vld [vmem:[%s4456_s30 + $0x66c] sm:$0xf0]  ;;  %v3631_v40 = vld [vmem:[%s4456_s30 + $0x760] sm:$0xf]  ;;  %2116 = vmatmul.bf16.vlgmr.msra.gmra.mxu3 %v4622_v35  ;;  %2125 = vmatpush.bf16.msrb.mxu0 %v3248_v43  ;;  %v3741_v29 = vld [vmem:[%s4456_s30 + $0xc4] sm:$0xf]  ;;  %v3188_v32 = vor.u32 %v3841_v23, %v3185_v24 }
 0x1fc   : > { %v3955_v41 = vld [vmem:[%s4456_s30 + $0x76c] sm:$0xf0]  ;;  %v3504_v45 = vor.u32 %v3923_v38, %v3503_v37  ;;  %v3231_v47 = vld [vmem:[%s4456_s30 + $0x440] sm:$0xf]  ;;  %2138 = vmatpush.bf16.msrb.mxu1 %v3376_v44  ;;  %v2785_v30 = vld [vmem:[%s4456_s30 + $0xd0] sm:$0xf0] }
 0x1fd   : > { %v3855_v48 = vld [vmem:[%s4456_s30 + $0x44c] sm:$0xf0]  ;;  %v3359_v49 = vld [vmem:[%s4456_s30 + $0x540] sm:$0xf]  ;;  %v3632_v50 = vor.u32 %v3955_v41, %v3631_v40  ;;  %v3773_v31 = vld [vmem:[%s4456_s30 + $0x1c4] sm:$0xf]  ;;  %v2788_v44 = vor.u32 %v3741_v29, %v2785_v30 }
 0x1fe   : > { %v3887_v42 = vld [vmem:[%s4456_s30 + $0x54c] sm:$0xf0]  ;;  %v3487_v46 = vld [vmem:[%s4456_s30 + $0x640] sm:$0xf]  ;;  %v3232_v54 = vor.u32 %v3855_v48, %v3231_v47  ;;  %2151 = vmatpush.bf16.msrb.mxu2 %v3504_v45  ;;  %v2913_v36 = vld [vmem:[%s4456_s30 + $0x1d0] sm:$0xf0] }
 0x1ff   : > { %v3919_v51 = vld [vmem:[%s4456_s30 + $0x64c] sm:$0xf0]  ;;  %v3615_v52 = vld [vmem:[%s4456_s30 + $0x740] sm:$0xf]  ;;  %v3360_v55 = vor.u32 %v3887_v42, %v3359_v49  ;;  %2164 = vmatpush.bf16.msrb.mxu3 %v3632_v50  ;;  %v3805_v37 = vld [vmem:[%s4456_s30 + $0x2c4] sm:$0xf]  ;;  %v2916_v49 = vor.u32 %v3773_v31, %v2913_v36 }
 0x200   : > { %v3951_v53 = vld [vmem:[%s4456_s30 + $0x74c] sm:$0xf0]  ;;  %v3488_v56 = vor.u32 %v3919_v51, %v3487_v46  ;;  %v3215_v57 = vld [vmem:[%s4456_s30 + $0x420] sm:$0xf]  ;;  %2126 = vmatpush.bf16.msrb.mxu0 %v3232_v54  ;;  %v3041_v38 = vld [vmem:[%s4456_s30 + $0x2d0] sm:$0xf0] }
 0x201   : > { %v3851_v58 = vld [vmem:[%s4456_s30 + $0x42c] sm:$0xf0]  ;;  %v3343_v59 = vld [vmem:[%s4456_s30 + $0x520] sm:$0xf]  ;;  %v3616_v60 = vor.u32 %v3951_v53, %v3615_v52  ;;  %2139 = vmatpush.bf16.msrb.mxu1 %v3360_v55  ;;  %v3837_v40 = vld [vmem:[%s4456_s30 + $0x3c4] sm:$0xf]  ;;  %v3044_v50 = vor.u32 %v3805_v37, %v3041_v38 }
 0x202   : > { %v3883_v61 = vld [vmem:[%s4456_s30 + $0x52c] sm:$0xf0]  ;;  %v3471_v62 = vld [vmem:[%s4456_s30 + $0x620] sm:$0xf]  ;;  %v3216_v2 = vor.u32 %v3851_v58, %v3215_v57  ;;  %2152 = vmatpush.bf16.msrb.mxu2 %v3488_v56  ;;  %v3169_v41 = vld [vmem:[%s4456_s30 + $0x3d0] sm:$0xf0] }
 0x203   : > { %v3915_v63 = vld [vmem:[%s4456_s30 + $0x62c] sm:$0xf0]  ;;  %v3599_v0 = vld [vmem:[%s4456_s30 + $0x720] sm:$0xf]  ;;  %v3344_v5 = vor.u32 %v3883_v61, %v3343_v59  ;;  %2165 = vmatpush.bf16.msrb.mxu3 %v3616_v60  ;;  %v4674_v43 = vld [vmem:[#allocation1 + $0x36] sm:$0xff]  ;;  %v3172_v52 = vor.u32 %v3837_v40, %v3169_v41 }
 0x204   : > { %v3947_v1 = vld [vmem:[%s4456_s30 + $0x72c] sm:$0xf0]  ;;  %v3199_v3 = vld [vmem:[%s4456_s30 + $0x400] sm:$0xf]  ;;  %v3472_v6 = vor.u32 %v3915_v63, %v3471_v62  ;;  %2127 = vmatpush.bf16.msrb.mxu0 %v3216_v2  ;;  %v3737_v48 = vld [vmem:[%s4456_s30 + $0xa4] sm:$0xf] }
 0x205   : > { %v3847_v4 = vld [vmem:[%s4456_s30 + $0x40c] sm:$0xf0]  ;;  %v3327_v7 = vld [vmem:[%s4456_s30 + $0x500] sm:$0xf]  ;;  %v3600_v10 = vor.u32 %v3947_v1, %v3599_v0  ;;  %2140 = vmatpush.bf16.msrb.mxu1 %v3344_v5  ;;  %v2769_v42 = vld [vmem:[%s4456_s30 + $0xb0] sm:$0xf0] }
 0x206   : > { %v3879_v8 = vld [vmem:[%s4456_s30 + $0x50c] sm:$0xf0]  ;;  %v3455_v9 = vld [vmem:[%s4456_s30 + $0x600] sm:$0xf]  ;;  %v3200_v17 = vor.u32 %v3847_v4, %v3199_v3  ;;  %2153 = vmatpush.bf16.msrb.mxu2 %v3472_v6  ;;  %v3769_v46 = vld [vmem:[%s4456_s30 + $0x1a4] sm:$0xf]  ;;  %v2772_v58 = vor.u32 %v3737_v48, %v2769_v42 }
 0x207   : > { %v3911_v11 = vld [vmem:[%s4456_s30 + $0x60c] sm:$0xf0]  ;;  %v3583_v12 = vld [vmem:[%s4456_s30 + $0x700] sm:$0xf]  ;;  %v3328_v21 = vor.u32 %v3879_v8, %v3327_v7  ;;  %2166 = vmatpush.bf16.msrb.mxu3 %v3600_v10  ;;  %v2897_v53 = vld [vmem:[%s4456_s30 + $0x1b0] sm:$0xf0] }
 0x208   : > { %v3943_v13 = vld [vmem:[%s4456_s30 + $0x70c] sm:$0xf0]  ;;  %v3456_v22 = vor.u32 %v3911_v11, %v3455_v9  ;;  %2128 = vmatpush.bf16.msrb.mxu0 %v3200_v17  ;;  %v4683_v51 = vld [vmem:[#allocation1 + $0x2d] sm:$0xff]  ;;  %v3801_v54 = vld [vmem:[%s4456_s30 + $0x2a4] sm:$0xf]  ;;  %v2900_v59 = vor.u32 %v3769_v46, %v2897_v53 }
 0x209   : > { %v3584_v25 = vor.u32 %v3943_v13, %v3583_v12  ;;  %2141 = vmatpush.bf16.msrb.mxu1 %v3328_v21  ;;  %v4676_v45 = vld [vmem:[#allocation1 + $0x24] sm:$0xff]  ;;  %v3833_v56 = vld [vmem:[%s4456_s30 + $0x3a4] sm:$0xf] }
 0x20a   : > { %2154 = vmatpush.bf16.msrb.mxu2 %v3456_v22  ;;  %v4678_v47 = vld [vmem:[#allocation1 + $0x3f] sm:$0xff]  ;;  %v3733_v61 = vld [vmem:[%s4456_s30 + $0x84] sm:$0xf] }
 0x20b   : > { %2167 = vmatpush.bf16.msrb.mxu3 %v3584_v25  ;;  %v3025_v55 = vld [vmem:[%s4456_s30 + $0x2b0] sm:$0xf0]  ;;  %2129 = vmatmul.bf16.vlgmr.msrb.gmra.mxu0 %v4676_v45  ;;  %v3765_v63 = vld [vmem:[%s4456_s30 + $0x184] sm:$0xf] }
 0x20c   : > { %2173 = vmatpush.bf16.msra.mxu0 %v2804_v26  ;;  %v3153_v57 = vld [vmem:[%s4456_s30 + $0x3b0] sm:$0xf0]  ;;  %2142 = vmatmul.bf16.vlgmr.msrb.gmra.mxu1 %v4683_v51  ;;  %v3028_v60 = vor.u32 %v3801_v54, %v3025_v55  ;;  %v3797_v2 = vld [vmem:[%s4456_s30 + $0x284] sm:$0xf] }
 0x20d   : > { %2186 = vmatpush.bf16.msra.mxu1 %v2932_v27  ;;  %2155 = vmatmul.bf16.vlgmr.msrb.gmra.mxu2 %v4674_v43  ;;  %v2753_v62 = vld [vmem:[%s4456_s30 + $0x90] sm:$0xf0]  ;;  %v3156_v0 = vor.u32 %v3833_v56, %v3153_v57  ;;  %v3829_v4 = vld [vmem:[%s4456_s30 + $0x384] sm:$0xf] }
 0x20e   : > { %2199 = vmatpush.bf16.msra.mxu2 %v3060_v28  ;;  %2168 = vmatmul.bf16.vlgmr.msrb.gmra.mxu3 %v4678_v47  ;;  %v2881_v1 = vld [vmem:[%s4456_s30 + $0x190] sm:$0xf0]  ;;  %v2756_v6 = vor.u32 %v3733_v61, %v2753_v62  ;;  %v3729_v9 = vld [vmem:[%s4456_s30 + $0x64] sm:$0xf] }
 0x20f   : > { %2212 = vmatpush.bf16.msra.mxu3 %v3188_v32  ;;  %v3009_v3 = vld [vmem:[%s4456_s30 + $0x290] sm:$0xf0]  ;;  %v2884_v7 = vor.u32 %v3765_v63, %v2881_v1  ;;  %v3761_v11 = vld [vmem:[%s4456_s30 + $0x164] sm:$0xf] }
 0x210   : > { %2174 = vmatpush.bf16.msra.mxu0 %v2788_v44  ;;  %v3137_v5 = vld [vmem:[%s4456_s30 + $0x390] sm:$0xf0]  ;;  %v3012_v8 = vor.u32 %v3797_v2, %v3009_v3  ;;  %v3793_v14 = vld [vmem:[%s4456_s30 + $0x264] sm:$0xf] }
 0x211   : > { %2187 = vmatpush.bf16.msra.mxu1 %v2916_v49  ;;  %v2737_v10 = vld [vmem:[%s4456_s30 + $0x70] sm:$0xf0]  ;;  %v3140_v12 = vor.u32 %v3829_v4, %v3137_v5  ;;  %v3825_v16 = vld [vmem:[%s4456_s30 + $0x364] sm:$0xf] }
 0x212   : > { %2200 = vmatpush.bf16.msra.mxu2 %v3044_v50  ;;  %v2865_v13 = vld [vmem:[%s4456_s30 + $0x170] sm:$0xf0]  ;;  %v2740_v18 = vor.u32 %v3729_v9, %v2737_v10  ;;  %v3725_v21 = vld [vmem:[%s4456_s30 + $0x44] sm:$0xf] }
 0x213   : > { %2213 = vmatpush.bf16.msra.mxu3 %v3172_v52  ;;  %v2993_v15 = vld [vmem:[%s4456_s30 + $0x270] sm:$0xf0]  ;;  %v2868_v19 = vor.u32 %v3761_v11, %v2865_v13  ;;  %v3757_v23 = vld [vmem:[%s4456_s30 + $0x144] sm:$0xf] }
 0x214   : > { %2175 = vmatpush.bf16.msra.mxu0 %v2772_v58  ;;  %v3121_v17 = vld [vmem:[%s4456_s30 + $0x370] sm:$0xf0]  ;;  %v2996_v20 = vor.u32 %v3793_v14, %v2993_v15  ;;  %v3789_v26 = vld [vmem:[%s4456_s30 + $0x244] sm:$0xf] }
 0x215   : > { %2188 = vmatpush.bf16.msra.mxu1 %v2900_v59  ;;  %v2721_v22 = vld [vmem:[%s4456_s30 + $0x50] sm:$0xf0]  ;;  %v3124_v24 = vor.u32 %v3825_v16, %v3121_v17  ;;  %v3821_v28 = vld [vmem:[%s4456_s30 + $0x344] sm:$0xf] }
 0x216   : > { %2201 = vmatpush.bf16.msra.mxu2 %v3028_v60  ;;  %v2849_v25 = vld [vmem:[%s4456_s30 + $0x150] sm:$0xf0]  ;;  %v2724_v30 = vor.u32 %v3725_v21, %v2721_v22  ;;  %v3721_v36 = vld [vmem:[%s4456_s30 + $0x24] sm:$0xf] }
 0x217   : > { %2214 = vmatpush.bf16.msra.mxu3 %v3156_v0  ;;  %v2977_v27 = vld [vmem:[%s4456_s30 + $0x250] sm:$0xf0]  ;;  %v2852_v31 = vor.u32 %v3757_v23, %v2849_v25  ;;  %v3753_v38 = vld [vmem:[%s4456_s30 + $0x124] sm:$0xf] }
 0x218   : > { %2176 = vmatpush.bf16.msra.mxu0 %v2756_v6  ;;  %v3105_v29 = vld [vmem:[%s4456_s30 + $0x350] sm:$0xf0]  ;;  %v2980_v32 = vor.u32 %v3789_v26, %v2977_v27  ;;  %v3785_v44 = vld [vmem:[%s4456_s30 + $0x224] sm:$0xf] }
 0x219   : > { %2189 = vmatpush.bf16.msra.mxu1 %v2884_v7  ;;  %v2705_v37 = vld [vmem:[%s4456_s30 + $0x30] sm:$0xf0]  ;;  %v3108_v40 = vor.u32 %v3821_v28, %v3105_v29  ;;  %v3817_v49 = vld [vmem:[%s4456_s30 + $0x324] sm:$0xf] }
 0x21a   : > { %2202 = vmatpush.bf16.msra.mxu2 %v3012_v8  ;;  %v2833_v41 = vld [vmem:[%s4456_s30 + $0x130] sm:$0xf0]  ;;  %v2708_v42 = vor.u32 %v3721_v36, %v2705_v37  ;;  %v3717_v46 = vld [vmem:[%s4456_s30 + $0x4] sm:$0xf] }
 0x21b   : > { %2215 = vmatpush.bf16.msra.mxu3 %v3140_v12  ;;  %v2961_v48 = vld [vmem:[%s4456_s30 + $0x230] sm:$0xf0]  ;;  %v2836_v53 = vor.u32 %v3753_v38, %v2833_v41  ;;  %v3749_v55 = vld [vmem:[%s4456_s30 + $0x104] sm:$0xf] }
 0x21c   : > { %2177 = vmatpush.bf16.msra.mxu0 %v2740_v18  ;;  %v3089_v50 = vld [vmem:[%s4456_s30 + $0x330] sm:$0xf0]  ;;  %v2964_v54 = vor.u32 %v3785_v44, %v2961_v48  ;;  %v3781_v57 = vld [vmem:[%s4456_s30 + $0x204] sm:$0xf] }
 0x21d   : > { %2190 = vmatpush.bf16.msra.mxu1 %v2868_v19  ;;  %v2689_v52 = vld [vmem:[%s4456_s30 + $0x10] sm:$0xf0]  ;;  %v3092_v58 = vor.u32 %v3817_v49, %v3089_v50  ;;  %v3813_v60 = vld [vmem:[%s4456_s30 + $0x304] sm:$0xf] }
 0x21e   : > { %2203 = vmatpush.bf16.msra.mxu2 %v2996_v20  ;;  %v2817_v56 = vld [vmem:[%s4456_s30 + $0x110] sm:$0xf0]  ;;  %v3873_v62 = vld [vmem:[%s4456_s30 + $0x4e4] sm:$0xf]  ;;  %v2692_v1 = vor.u32 %v3717_v46, %v2689_v52 }
 0x21f   : > { %2216 = vmatpush.bf16.msra.mxu3 %v3124_v24  ;;  %v2945_v59 = vld [vmem:[%s4456_s30 + $0x210] sm:$0xf0]  ;;  %v3905_v0 = vld [vmem:[%s4456_s30 + $0x5e4] sm:$0xf]  ;;  %v2820_v5 = vor.u32 %v3749_v55, %v2817_v56 }
 0x220   : > { %2178 = vmatpush.bf16.msra.mxu0 %v2724_v30  ;;  %v3073_v61 = vld [vmem:[%s4456_s30 + $0x310] sm:$0xf0]  ;;  %v3937_v3 = vld [vmem:[%s4456_s30 + $0x6e4] sm:$0xf]  ;;  %v2948_v6 = vor.u32 %v3781_v57, %v2945_v59 }
 0x221   : > { %2191 = vmatpush.bf16.msra.mxu1 %v2852_v31  ;;  %v3313_v63 = vld [vmem:[%s4456_s30 + $0x4f0] sm:$0xf0]  ;;  %v3969_v7 = vld [vmem:[%s4456_s30 + $0x7e4] sm:$0xf]  ;;  %v3076_v9 = vor.u32 %v3813_v60, %v3073_v61 }
 0x222   : > { %2204 = vmatpush.bf16.msra.mxu2 %v2980_v32  ;;  %v3441_v2 = vld [vmem:[%s4456_s30 + $0x5f0] sm:$0xf0]  ;;  %v3316_v10 = vor.u32 %v3873_v62, %v3313_v63  ;;  %v3869_v13 = vld [vmem:[%s4456_s30 + $0x4c4] sm:$0xf] }
 0x223   : > { %2217 = vmatpush.bf16.msra.mxu3 %v3108_v40  ;;  %v3569_v4 = vld [vmem:[%s4456_s30 + $0x6f0] sm:$0xf0]  ;;  %v3444_v11 = vor.u32 %v3905_v0, %v3441_v2  ;;  %v3901_v15 = vld [vmem:[%s4456_s30 + $0x5c4] sm:$0xf] }
 0x224   : > { %2179 = vmatpush.bf16.msra.mxu0 %v2708_v42  ;;  %v3697_v8 = vld [vmem:[%s4456_s30 + $0x7f0] sm:$0xf0]  ;;  %v3572_v12 = vor.u32 %v3937_v3, %v3569_v4  ;;  %v3933_v18 = vld [vmem:[%s4456_s30 + $0x6c4] sm:$0xf] }
 0x225   : > { %2192 = vmatpush.bf16.msra.mxu1 %v2836_v53  ;;  %v3297_v14 = vld [vmem:[%s4456_s30 + $0x4d0] sm:$0xf0]  ;;  %v3700_v16 = vor.u32 %v3969_v7, %v3697_v8  ;;  %v3965_v20 = vld [vmem:[%s4456_s30 + $0x7c4] sm:$0xf] }
 0x226   : > { %2205 = vmatpush.bf16.msra.mxu2 %v2964_v54  ;;  %v3425_v17 = vld [vmem:[%s4456_s30 + $0x5d0] sm:$0xf0]  ;;  %v3300_v22 = vor.u32 %v3869_v13, %v3297_v14  ;;  %v3865_v25 = vld [vmem:[%s4456_s30 + $0x4a4] sm:$0xf] }
 0x227   : > { %2218 = vmatpush.bf16.msra.mxu3 %v3092_v58  ;;  %v3553_v19 = vld [vmem:[%s4456_s30 + $0x6d0] sm:$0xf0]  ;;  %v3428_v23 = vor.u32 %v3901_v15, %v3425_v17  ;;  %v3897_v27 = vld [vmem:[%s4456_s30 + $0x5a4] sm:$0xf] }
 0x228   : > { %2180 = vmatpush.bf16.msra.mxu0 %v2692_v1  ;;  %v3681_v21 = vld [vmem:[%s4456_s30 + $0x7d0] sm:$0xf0]  ;;  %v3556_v24 = vor.u32 %v3933_v18, %v3553_v19  ;;  %v3929_v30 = vld [vmem:[%s4456_s30 + $0x6a4] sm:$0xf] }
 0x229   : > { %2193 = vmatpush.bf16.msra.mxu1 %v2820_v5  ;;  %v3281_v26 = vld [vmem:[%s4456_s30 + $0x4b0] sm:$0xf0]  ;;  %v3684_v28 = vor.u32 %v3965_v20, %v3681_v21  ;;  %v3961_v32 = vld [vmem:[%s4456_s30 + $0x7a4] sm:$0xf] }
 0x22a   : > { %2206 = vmatpush.bf16.msra.mxu2 %v2948_v6  ;;  %v3409_v29 = vld [vmem:[%s4456_s30 + $0x5b0] sm:$0xf0]  ;;  %v3284_v37 = vor.u32 %v3865_v25, %v3281_v26  ;;  %v3861_v41 = vld [vmem:[%s4456_s30 + $0x484] sm:$0xf] }
 0x22b   : > { %2219 = vmatpush.bf16.msra.mxu3 %v3076_v9  ;;  %v3537_v31 = vld [vmem:[%s4456_s30 + $0x6b0] sm:$0xf0]  ;;  %2181 = vmatmul.bf16.vlgmr.msra.gmra.mxu0 %v4620_v34  ;;  %v3412_v38 = vor.u32 %v3897_v27, %v3409_v29  ;;  %v3893_v48 = vld [vmem:[%s4456_s30 + $0x584] sm:$0xf] }
 0x22c   : > { %2225 = vmatpush.bf16.msrb.mxu0 %v3316_v10  ;;  %v3665_v36 = vld [vmem:[%s4456_s30 + $0x7b0] sm:$0xf0]  ;;  %2194 = vmatmul.bf16.vlgmr.msra.gmra.mxu1 %v4627_v39  ;;  %v3540_v40 = vor.u32 %v3929_v30, %v3537_v31  ;;  %v3925_v42 = vld [vmem:[%s4456_s30 + $0x684] sm:$0xf] }
 0x22d   : > { %2238 = vmatpush.bf16.msrb.mxu1 %v3444_v11  ;;  %2207 = vmatmul.bf16.vlgmr.msra.gmra.mxu2 %v4618_v33  ;;  %v3265_v44 = vld [vmem:[%s4456_s30 + $0x490] sm:$0xf0]  ;;  %v3668_v49 = vor.u32 %v3961_v32, %v3665_v36  ;;  %v3957_v52 = vld [vmem:[%s4456_s30 + $0x784] sm:$0xf] }
 0x22e   : > { %2251 = vmatpush.bf16.msrb.mxu2 %v3572_v12  ;;  %2220 = vmatmul.bf16.vlgmr.msra.gmra.mxu3 %v4622_v35  ;;  %v3393_v50 = vld [vmem:[%s4456_s30 + $0x590] sm:$0xf0]  ;;  %v3268_v54 = vor.u32 %v3861_v41, %v3265_v44  ;;  %v3857_v57 = vld [vmem:[%s4456_s30 + $0x464] sm:$0xf]  ;;  %v2807_v44 = vld [vmem:[%s4456_s30 + $0xe8] sm:$0xf] }
 0x22f   : > { %2264 = vmatpush.bf16.msrb.mxu3 %v3700_v16  ;;  %v3521_v46 = vld [vmem:[%s4456_s30 + $0x690] sm:$0xf0]  ;;  %v3396_v55 = vor.u32 %v3893_v48, %v3393_v50  ;;  %v3889_v59 = vld [vmem:[%s4456_s30 + $0x564] sm:$0xf]  ;;  %v3748_v48 = vld [vmem:[%s4456_s30 + $0xf4] sm:$0xf0] }
 0x230   : > { %2226 = vmatpush.bf16.msrb.mxu0 %v3300_v22  ;;  %v3649_v53 = vld [vmem:[%s4456_s30 + $0x790] sm:$0xf0]  ;;  %v3524_v56 = vor.u32 %v3925_v42, %v3521_v46  ;;  %v3921_v62 = vld [vmem:[%s4456_s30 + $0x664] sm:$0xf]  ;;  %v3780_v42 = vld [vmem:[%s4456_s30 + $0x1f4] sm:$0xf0] }
 0x231   : > { %2239 = vmatpush.bf16.msrb.mxu1 %v3428_v23  ;;  %v3249_v58 = vld [vmem:[%s4456_s30 + $0x470] sm:$0xf0]  ;;  %v3652_v60 = vor.u32 %v3957_v52, %v3649_v53  ;;  %v3953_v0 = vld [vmem:[%s4456_s30 + $0x764] sm:$0xf]  ;;  %v3063_v46 = vld [vmem:[%s4456_s30 + $0x2e8] sm:$0xf] }
 0x232   : > { %2252 = vmatpush.bf16.msrb.mxu2 %v3556_v24  ;;  %v3377_v61 = vld [vmem:[%s4456_s30 + $0x570] sm:$0xf0]  ;;  %v3252_v2 = vor.u32 %v3857_v57, %v3249_v58  ;;  %v3853_v5 = vld [vmem:[%s4456_s30 + $0x444] sm:$0xf]  ;;  %v3812_v52 = vld [vmem:[%s4456_s30 + $0x2f4] sm:$0xf0]  ;;  %v2808_v58 = vor.u32 %v3748_v48, %v2807_v44 }
 0x233   : > { %2265 = vmatpush.bf16.msrb.mxu3 %v3684_v28  ;;  %v3505_v63 = vld [vmem:[%s4456_s30 + $0x670] sm:$0xf0]  ;;  %v3380_v3 = vor.u32 %v3889_v59, %v3377_v61  ;;  %v3885_v7 = vld [vmem:[%s4456_s30 + $0x544] sm:$0xf]  ;;  %v2791_v61 = vld [vmem:[%s4456_s30 + $0xc8] sm:$0xf] }
 0x234   : > { %2227 = vmatpush.bf16.msrb.mxu0 %v3284_v37  ;;  %v3633_v1 = vld [vmem:[%s4456_s30 + $0x770] sm:$0xf0]  ;;  %v3508_v4 = vor.u32 %v3921_v62, %v3505_v63  ;;  %v3917_v10 = vld [vmem:[%s4456_s30 + $0x644] sm:$0xf]  ;;  %v3744_v62 = vld [vmem:[%s4456_s30 + $0xd4] sm:$0xf0] }
 0x235   : > { %2240 = vmatpush.bf16.msrb.mxu1 %v3412_v38  ;;  %v3233_v6 = vld [vmem:[%s4456_s30 + $0x450] sm:$0xf0]  ;;  %v3636_v8 = vor.u32 %v3953_v0, %v3633_v1  ;;  %v3949_v12 = vld [vmem:[%s4456_s30 + $0x744] sm:$0xf]  ;;  %v2919_v63 = vld [vmem:[%s4456_s30 + $0x1c8] sm:$0xf] }
 0x236   : > { %2253 = vmatpush.bf16.msrb.mxu2 %v3540_v40  ;;  %v3361_v9 = vld [vmem:[%s4456_s30 + $0x550] sm:$0xf0]  ;;  %v3236_v14 = vor.u32 %v3853_v5, %v3233_v6  ;;  %v3849_v17 = vld [vmem:[%s4456_s30 + $0x424] sm:$0xf]  ;;  %v3776_v1 = vld [vmem:[%s4456_s30 + $0x1d4] sm:$0xf0]  ;;  %v2792_v6 = vor.u32 %v3744_v62, %v2791_v61 }
 0x237   : > { %2266 = vmatpush.bf16.msrb.mxu3 %v3668_v49  ;;  %v3489_v11 = vld [vmem:[%s4456_s30 + $0x650] sm:$0xf0]  ;;  %v3364_v15 = vor.u32 %v3885_v7, %v3361_v9  ;;  %v3881_v19 = vld [vmem:[%s4456_s30 + $0x524] sm:$0xf]  ;;  %v2935_v49 = vld [vmem:[%s4456_s30 + $0x1e8] sm:$0xf]  ;;  %v2920_v7 = vor.u32 %v3776_v1, %v2919_v63 }
 0x238   : > { %2228 = vmatpush.bf16.msrb.mxu0 %v3268_v54  ;;  %v3617_v13 = vld [vmem:[%s4456_s30 + $0x750] sm:$0xf0]  ;;  %v3492_v16 = vor.u32 %v3917_v10, %v3489_v11  ;;  %v3913_v22 = vld [vmem:[%s4456_s30 + $0x624] sm:$0xf]  ;;  %v2936_v59 = vor.u32 %v3780_v42, %v2935_v49  ;;  %v3840_v5 = vld [vmem:[%s4456_s30 + $0x3d4] sm:$0xf0] }
 0x239   : > { %2241 = vmatpush.bf16.msrb.mxu1 %v3396_v55  ;;  %v3217_v18 = vld [vmem:[%s4456_s30 + $0x430] sm:$0xf0]  ;;  %v3620_v20 = vor.u32 %v3949_v12, %v3617_v13  ;;  %v3945_v24 = vld [vmem:[%s4456_s30 + $0x724] sm:$0xf]  ;;  %v3191_v55 = vld [vmem:[%s4456_s30 + $0x3e8] sm:$0xf] }
 0x23a   : > { %2254 = vmatpush.bf16.msrb.mxu2 %v3524_v56  ;;  %v3345_v21 = vld [vmem:[%s4456_s30 + $0x530] sm:$0xf0]  ;;  %v3220_v26 = vor.u32 %v3849_v17, %v3217_v18  ;;  %v3845_v27 = vld [vmem:[%s4456_s30 + $0x404] sm:$0xf]  ;;  %v3844_v56 = vld [vmem:[%s4456_s30 + $0x3f4] sm:$0xf0] }
 0x23b   : > { %2267 = vmatpush.bf16.msrb.mxu3 %v3652_v60  ;;  %v3473_v23 = vld [vmem:[%s4456_s30 + $0x630] sm:$0xf0]  ;;  %v3348_v29 = vor.u32 %v3881_v19, %v3345_v21  ;;  %v3877_v31 = vld [vmem:[%s4456_s30 + $0x504] sm:$0xf]  ;;  %v3064_v60 = vor.u32 %v3812_v52, %v3063_v46  ;;  %v3192_v0 = vor.u32 %v3844_v56, %v3191_v55  ;;  %v2775_v9 = vld [vmem:[%s4456_s30 + $0xa8] sm:$0xf] }
 0x23c   : > { %2229 = vmatpush.bf16.msrb.mxu0 %v3252_v2  ;;  %v3601_v25 = vld [vmem:[%s4456_s30 + $0x730] sm:$0xf0]  ;;  %v3476_v30 = vor.u32 %v3913_v22, %v3473_v23  ;;  %v3909_v36 = vld [vmem:[%s4456_s30 + $0x604] sm:$0xf]  ;;  %v3047_v2 = vld [vmem:[%s4456_s30 + $0x2c8] sm:$0xf] }
 0x23d   : > { %2242 = vmatpush.bf16.msrb.mxu1 %v3380_v3  ;;  %v3201_v28 = vld [vmem:[%s4456_s30 + $0x410] sm:$0xf0]  ;;  %v3604_v37 = vor.u32 %v3945_v24, %v3601_v25  ;;  %v3941_v40 = vld [vmem:[%s4456_s30 + $0x704] sm:$0xf]  ;;  %v3808_v3 = vld [vmem:[%s4456_s30 + $0x2d4] sm:$0xf0] }
 0x23e   : > { %2255 = vmatpush.bf16.msrb.mxu2 %v3508_v4  ;;  %v3329_v32 = vld [vmem:[%s4456_s30 + $0x510] sm:$0xf0]  ;;  %v3204_v50 = vor.u32 %v3845_v27, %v3201_v28  ;;  %v3175_v4 = vld [vmem:[%s4456_s30 + $0x3c8] sm:$0xf]  ;;  %v3740_v10 = vld [vmem:[%s4456_s30 + $0xb4] sm:$0xf0] }
 0x23f   : > { %2268 = vmatpush.bf16.msrb.mxu3 %v3636_v8  ;;  %v3457_v38 = vld [vmem:[%s4456_s30 + $0x610] sm:$0xf0]  ;;  %v3332_v53 = vor.u32 %v3877_v31, %v3329_v32  ;;  %v3048_v8 = vor.u32 %v3808_v3, %v3047_v2  ;;  %v2903_v11 = vld [vmem:[%s4456_s30 + $0x1a8] sm:$0xf]  ;;  %v3176_v12 = vor.u32 %v3840_v5, %v3175_v4  ;;  %v3772_v13 = vld [vmem:[%s4456_s30 + $0x1b4] sm:$0xf0] }
 0x240   : > { %2230 = vmatpush.bf16.msrb.mxu0 %v3236_v14  ;;  %v3585_v41 = vld [vmem:[%s4456_s30 + $0x710] sm:$0xf0]  ;;  %v3460_v54 = vor.u32 %v3909_v36, %v3457_v38  ;;  %v3031_v14 = vld [vmem:[%s4456_s30 + $0x2a8] sm:$0xf]  ;;  %v3836_v17 = vld [vmem:[%s4456_s30 + $0x3b4] sm:$0xf0]  ;;  %v2904_v18 = vor.u32 %v3772_v13, %v2903_v11 }
 0x241   : > { %2243 = vmatpush.bf16.msrb.mxu1 %v3364_v15  ;;  %v3588_v57 = vor.u32 %v3941_v40, %v3585_v41  ;;  %v3804_v15 = vld [vmem:[%s4456_s30 + $0x2b4] sm:$0xf0]  ;;  %v2887_v21 = vld [vmem:[%s4456_s30 + $0x188] sm:$0xf] }
 0x242   : > { %2256 = vmatpush.bf16.msrb.mxu2 %v3492_v16  ;;  %v3159_v16 = vld [vmem:[%s4456_s30 + $0x3a8] sm:$0xf]  ;;  %v3032_v19 = vor.u32 %v3804_v15, %v3031_v14  ;;  %v3768_v22 = vld [vmem:[%s4456_s30 + $0x194] sm:$0xf0] }
 0x243   : > { %2269 = vmatpush.bf16.msrb.mxu3 %v3620_v20  ;;  %v2759_v20 = vld [vmem:[%s4456_s30 + $0x88] sm:$0xf]  ;;  %v3800_v24 = vld [vmem:[%s4456_s30 + $0x294] sm:$0xf0]  ;;  %v2888_v27 = vor.u32 %v3768_v22, %v2887_v21 }
 0x244   : > { %2231 = vmatpush.bf16.msrb.mxu0 %v3220_v26  ;;  %v3015_v23 = vld [vmem:[%s4456_s30 + $0x288] sm:$0xf]  ;;  %v3832_v25 = vld [vmem:[%s4456_s30 + $0x394] sm:$0xf0] }
 0x245   : > { %2244 = vmatpush.bf16.msrb.mxu1 %v3348_v29  ;;  %v3016_v28 = vor.u32 %v3800_v24, %v3015_v23  ;;  %v2743_v29 = vld [vmem:[%s4456_s30 + $0x68] sm:$0xf]  ;;  %v3764_v36 = vld [vmem:[%s4456_s30 + $0x174] sm:$0xf0] }
 0x246   : > { %2257 = vmatpush.bf16.msrb.mxu2 %v3476_v30  ;;  %v3732_v30 = vld [vmem:[%s4456_s30 + $0x74] sm:$0xf0]  ;;  %v2871_v31 = vld [vmem:[%s4456_s30 + $0x168] sm:$0xf] }
 0x247   : > { %2270 = vmatpush.bf16.msrb.mxu3 %v3604_v37  ;;  %v2999_v37 = vld [vmem:[%s4456_s30 + $0x268] sm:$0xf]  ;;  %v3796_v38 = vld [vmem:[%s4456_s30 + $0x274] sm:$0xf0]  ;;  %v2744_v44 = vor.u32 %v3732_v30, %v2743_v29  ;;  %v2872_v48 = vor.u32 %v3764_v36, %v2871_v31 }
 0x248   : > { %2232 = vmatpush.bf16.msrb.mxu0 %v3204_v50  ;;  %v3127_v40 = vld [vmem:[%s4456_s30 + $0x368] sm:$0xf]  ;;  %v3828_v41 = vld [vmem:[%s4456_s30 + $0x374] sm:$0xf0]  ;;  %v3000_v49 = vor.u32 %v3796_v38, %v2999_v37 }
 0x249   : > { %2245 = vmatpush.bf16.msrb.mxu1 %v3332_v53  ;;  %v2727_v50 = vld [vmem:[%s4456_s30 + $0x48] sm:$0xf]  ;;  %v3728_v42 = vld [vmem:[%s4456_s30 + $0x54] sm:$0xf0]  ;;  %v3128_v52 = vor.u32 %v3828_v41, %v3127_v40 }
 0x24a   : > { %2258 = vmatpush.bf16.msrb.mxu2 %v3460_v54  ;;  %v2855_v46 = vld [vmem:[%s4456_s30 + $0x148] sm:$0xf]  ;;  %v3760_v53 = vld [vmem:[%s4456_s30 + $0x154] sm:$0xf0] }
 0x24b   : > { %2271 = vmatpush.bf16.msrb.mxu3 %v3588_v57  ;;  %2233 = vmatmul.bf16.vlgmr.msrb.gmra.mxu0 %v4676_v45  ;;  %v3736_v45 = vld [vmem:[%s4456_s30 + $0x94] sm:$0xf0]  ;;  %v2983_v54 = vld [vmem:[%s4456_s30 + $0x248] sm:$0xf] }
 0x24c   : > { %2277 = vmatpush.bf16.msra.mxu0 %v2808_v58  ;;  %2246 = vmatmul.bf16.vlgmr.msrb.gmra.mxu1 %v4683_v51  ;;  %v3143_v51 = vld [vmem:[%s4456_s30 + $0x388] sm:$0xf]  ;;  %v2760_v26 = vor.u32 %v3736_v45, %v2759_v20  ;;  %v3792_v55 = vld [vmem:[%s4456_s30 + $0x254] sm:$0xf0]  ;;  %v2728_v58 = vor.u32 %v3728_v42, %v2727_v50 }
 0x24d   : > { %2290 = vmatpush.bf16.msra.mxu1 %v2936_v59  ;;  %2259 = vmatmul.bf16.vlgmr.msrb.gmra.mxu2 %v4674_v43  ;;  %v2776_v43 = vor.u32 %v3740_v10, %v2775_v9  ;;  %v3144_v32 = vor.u32 %v3832_v25, %v3143_v51  ;;  %v3111_v56 = vld [vmem:[%s4456_s30 + $0x348] sm:$0xf]  ;;  %v3824_v57 = vld [vmem:[%s4456_s30 + $0x354] sm:$0xf0]  ;;  %v2856_v59 = vor.u32 %v3760_v53, %v2855_v46 }
 0x24e   : > { %2303 = vmatpush.bf16.msra.mxu2 %v3064_v60  ;;  %2272 = vmatmul.bf16.vlgmr.msrb.gmra.mxu3 %v4678_v47  ;;  %v3160_v47 = vor.u32 %v3836_v17, %v3159_v16  ;;  %v2984_v60 = vor.u32 %v3792_v55, %v2983_v54  ;;  %v2711_v61 = vld [vmem:[%s4456_s30 + $0x28] sm:$0xf]  ;;  %v3724_v62 = vld [vmem:[%s4456_s30 + $0x34] sm:$0xf0] }
 0x24f   : > { %2316 = vmatpush.bf16.msra.mxu3 %v3192_v0  ;;  %v2839_v63 = vld [vmem:[%s4456_s30 + $0x128] sm:$0xf]  ;;  %v3112_v0 = vor.u32 %v3824_v57, %v3111_v56  ;;  %v3756_v1 = vld [vmem:[%s4456_s30 + $0x134] sm:$0xf0] }
 0x250   : > { %2278 = vmatpush.bf16.msra.mxu0 %v2792_v6  ;;  %v2967_v2 = vld [vmem:[%s4456_s30 + $0x228] sm:$0xf]  ;;  %v3788_v3 = vld [vmem:[%s4456_s30 + $0x234] sm:$0xf0]  ;;  %v2712_v6 = vor.u32 %v3724_v62, %v2711_v61  ;;  %v2840_v9 = vor.u32 %v3756_v1, %v2839_v63 }
 0x251   : > { %2291 = vmatpush.bf16.msra.mxu1 %v2920_v7  ;;  %v3095_v4 = vld [vmem:[%s4456_s30 + $0x328] sm:$0xf]  ;;  %v3820_v5 = vld [vmem:[%s4456_s30 + $0x334] sm:$0xf0]  ;;  %v2968_v10 = vor.u32 %v3788_v3, %v2967_v2 }
 0x252   : > { %2304 = vmatpush.bf16.msra.mxu2 %v3048_v8  ;;  %v2695_v7 = vld [vmem:[%s4456_s30 + $0x8] sm:$0xf]  ;;  %v3720_v8 = vld [vmem:[%s4456_s30 + $0x14] sm:$0xf0]  ;;  %v3096_v14 = vor.u32 %v3820_v5, %v3095_v4 }
 0x253   : > { %2317 = vmatpush.bf16.msra.mxu3 %v3176_v12  ;;  %v2823_v11 = vld [vmem:[%s4456_s30 + $0x108] sm:$0xf]  ;;  %v3752_v12 = vld [vmem:[%s4456_s30 + $0x114] sm:$0xf0]  ;;  %v2696_v20 = vor.u32 %v3720_v8, %v2695_v7 }
 0x254   : > { %2279 = vmatpush.bf16.msra.mxu0 %v2776_v43  ;;  %v2951_v13 = vld [vmem:[%s4456_s30 + $0x208] sm:$0xf]  ;;  %v3784_v15 = vld [vmem:[%s4456_s30 + $0x214] sm:$0xf0]  ;;  %v2824_v22 = vor.u32 %v3752_v12, %v2823_v11 }
 0x255   : > { %2292 = vmatpush.bf16.msra.mxu1 %v2904_v18  ;;  %v3079_v16 = vld [vmem:[%s4456_s30 + $0x308] sm:$0xf]  ;;  %v3816_v17 = vld [vmem:[%s4456_s30 + $0x314] sm:$0xf0]  ;;  %v2952_v23 = vor.u32 %v3784_v15, %v2951_v13 }
 0x256   : > { %2305 = vmatpush.bf16.msra.mxu2 %v3032_v19  ;;  %v3319_v43 = vld [vmem:[%s4456_s30 + $0x4e8] sm:$0xf]  ;;  %v3876_v18 = vld [vmem:[%s4456_s30 + $0x4f4] sm:$0xf0]  ;;  %v3080_v25 = vor.u32 %v3816_v17, %v3079_v16 }
 0x257   : > { %2318 = vmatpush.bf16.msra.mxu3 %v3160_v47  ;;  %v3447_v19 = vld [vmem:[%s4456_s30 + $0x5e8] sm:$0xf]  ;;  %v3908_v45 = vld [vmem:[%s4456_s30 + $0x5f4] sm:$0xf0] }
 0x258   : > { %2280 = vmatpush.bf16.msra.mxu0 %v2760_v26  ;;  %v3575_v21 = vld [vmem:[%s4456_s30 + $0x6e8] sm:$0xf]  ;;  %v3940_v47 = vld [vmem:[%s4456_s30 + $0x6f4] sm:$0xf0]  ;;  %v3320_v26 = vor.u32 %v3876_v18, %v3319_v43 }
 0x259   : > { %2293 = vmatpush.bf16.msra.mxu1 %v2888_v27  ;;  %v3703_v24 = vld [vmem:[%s4456_s30 + $0x7e8] sm:$0xf]  ;;  %v3972_v51 = vld [vmem:[%s4456_s30 + $0x7f4] sm:$0xf0]  ;;  %v3448_v27 = vor.u32 %v3908_v45, %v3447_v19 }
 0x25a   : > { %2306 = vmatpush.bf16.msra.mxu2 %v3016_v28  ;;  %v3576_v28 = vor.u32 %v3940_v47, %v3575_v21  ;;  %v3303_v29 = vld [vmem:[%s4456_s30 + $0x4c8] sm:$0xf]  ;;  %v3872_v30 = vld [vmem:[%s4456_s30 + $0x4d4] sm:$0xf0] }
 0x25b   : > { %2319 = vmatpush.bf16.msra.mxu3 %v3144_v32  ;;  %v3431_v31 = vld [vmem:[%s4456_s30 + $0x5c8] sm:$0xf]  ;;  %v3704_v32 = vor.u32 %v3972_v51, %v3703_v24  ;;  %v3904_v36 = vld [vmem:[%s4456_s30 + $0x5d4] sm:$0xf0] }
 0x25c   : > { %2281 = vmatpush.bf16.msra.mxu0 %v2744_v44  ;;  %v3559_v37 = vld [vmem:[%s4456_s30 + $0x6c8] sm:$0xf]  ;;  %v3936_v38 = vld [vmem:[%s4456_s30 + $0x6d4] sm:$0xf0]  ;;  %v3304_v44 = vor.u32 %v3872_v30, %v3303_v29 }
 0x25d   : > { %2294 = vmatpush.bf16.msra.mxu1 %v2872_v48  ;;  %v3687_v40 = vld [vmem:[%s4456_s30 + $0x7c8] sm:$0xf]  ;;  %v3968_v41 = vld [vmem:[%s4456_s30 + $0x7d4] sm:$0xf0]  ;;  %v3432_v48 = vor.u32 %v3904_v36, %v3431_v31 }
 0x25e   : > { %2307 = vmatpush.bf16.msra.mxu2 %v3000_v49  ;;  %v3560_v49 = vor.u32 %v3936_v38, %v3559_v37  ;;  %v3287_v50 = vld [vmem:[%s4456_s30 + $0x4a8] sm:$0xf]  ;;  %v3868_v42 = vld [vmem:[%s4456_s30 + $0x4b4] sm:$0xf0] }
 0x25f   : > { %2320 = vmatpush.bf16.msra.mxu3 %v3128_v52  ;;  %v3415_v46 = vld [vmem:[%s4456_s30 + $0x5a8] sm:$0xf]  ;;  %v3688_v52 = vor.u32 %v3968_v41, %v3687_v40  ;;  %v3900_v53 = vld [vmem:[%s4456_s30 + $0x5b4] sm:$0xf0] }
 0x260   : > { %2282 = vmatpush.bf16.msra.mxu0 %v2728_v58  ;;  %v3543_v54 = vld [vmem:[%s4456_s30 + $0x6a8] sm:$0xf]  ;;  %v3932_v55 = vld [vmem:[%s4456_s30 + $0x6b4] sm:$0xf0]  ;;  %v3288_v58 = vor.u32 %v3868_v42, %v3287_v50 }
 0x261   : > { %2295 = vmatpush.bf16.msra.mxu1 %v2856_v59  ;;  %v3671_v56 = vld [vmem:[%s4456_s30 + $0x7a8] sm:$0xf]  ;;  %v3964_v57 = vld [vmem:[%s4456_s30 + $0x7b4] sm:$0xf0]  ;;  %v3416_v59 = vor.u32 %v3900_v53, %v3415_v46 }
 0x262   : > { %2308 = vmatpush.bf16.msra.mxu2 %v2984_v60  ;;  %v3544_v60 = vor.u32 %v3932_v55, %v3543_v54  ;;  %v3864_v61 = vld [vmem:[%s4456_s30 + $0x494] sm:$0xf0]  ;;  %v3399_v62 = vld [vmem:[%s4456_s30 + $0x588] sm:$0xf] }
 0x263   : > { %2321 = vmatpush.bf16.msra.mxu3 %v3112_v0  ;;  %v3896_v63 = vld [vmem:[%s4456_s30 + $0x594] sm:$0xf0]  ;;  %v3655_v1 = vld [vmem:[%s4456_s30 + $0x788] sm:$0xf] }
 0x264   : > { %2283 = vmatpush.bf16.msra.mxu0 %v2712_v6  ;;  %v3928_v0 = vld [vmem:[%s4456_s30 + $0x694] sm:$0xf0]  ;;  %v3400_v3 = vor.u32 %v3896_v63, %v3399_v62  ;;  %v3255_v5 = vld [vmem:[%s4456_s30 + $0x468] sm:$0xf]  ;;  %v3810_v63 = vld [vmem:[%s4456_s30 + $0x2ec] sm:$0xf] }
 0x265   : > { %2296 = vmatpush.bf16.msra.mxu1 %v2840_v9  ;;  %v3860_v6 = vld [vmem:[%s4456_s30 + $0x474] sm:$0xf0]  ;;  %v3383_v7 = vld [vmem:[%s4456_s30 + $0x568] sm:$0xf] }
 0x266   : > { %2309 = vmatpush.bf16.msra.mxu2 %v2968_v10  ;;  %v3892_v9 = vld [vmem:[%s4456_s30 + $0x574] sm:$0xf0]  ;;  %v3511_v10 = vld [vmem:[%s4456_s30 + $0x668] sm:$0xf] }
 0x267   : > { %2322 = vmatpush.bf16.msra.mxu3 %v3096_v14  ;;  %v3924_v11 = vld [vmem:[%s4456_s30 + $0x674] sm:$0xf0]  ;;  %v3639_v12 = vld [vmem:[%s4456_s30 + $0x768] sm:$0xf]  ;;  %v3256_v14 = vor.u32 %v3860_v6, %v3255_v5  ;;  %v3384_v15 = vor.u32 %v3892_v9, %v3383_v7  ;;  %v2091_v29 = vpop.f32.mrf.mxu1 }
 0x268   : > { %2284 = vmatpush.bf16.msra.mxu0 %v2696_v20  ;;  %v3956_v13 = vld [vmem:[%s4456_s30 + $0x774] sm:$0xf0]  ;;  %v3512_v16 = vor.u32 %v3924_v11, %v3511_v10  ;;  %v3239_v17 = vld [vmem:[%s4456_s30 + $0x448] sm:$0xf]  ;;  %v3742_v10 = vld [vmem:[%s4456_s30 + $0xcc] sm:$0xf] }
 0x269   : > { %2297 = vmatpush.bf16.msra.mxu1 %v2824_v22  ;;  %v3856_v43 = vld [vmem:[%s4456_s30 + $0x454] sm:$0xf0]  ;;  %v3367_v18 = vld [vmem:[%s4456_s30 + $0x548] sm:$0xf]  ;;  %v3640_v19 = vor.u32 %v3956_v13, %v3639_v12  ;;  %v2793_v11 = vld [vmem:[%s4456_s30 + $0xd8] sm:$0xf0] }
 0x26a   : > { %2310 = vmatpush.bf16.msra.mxu2 %v2952_v23  ;;  %v3888_v20 = vld [vmem:[%s4456_s30 + $0x554] sm:$0xf0]  ;;  %v3495_v45 = vld [vmem:[%s4456_s30 + $0x648] sm:$0xf]  ;;  %v3240_v23 = vor.u32 %v3856_v43, %v3239_v17  ;;  %v3774_v12 = vld [vmem:[%s4456_s30 + $0x1cc] sm:$0xf] }
 0x26b   : > { %2323 = vmatpush.bf16.msra.mxu3 %v3080_v25  ;;  %2285 = vmatmul.bf16.vlgmr.msra.gmra.mxu0 %v4620_v34  ;;  %v3672_v34 = vor.u32 %v3964_v57, %v3671_v56  ;;  %v3920_v21 = vld [vmem:[%s4456_s30 + $0x654] sm:$0xf0]  ;;  %v3623_v47 = vld [vmem:[%s4456_s30 + $0x748] sm:$0xf]  ;;  %v3368_v51 = vor.u32 %v3888_v20, %v3367_v18  ;;  %v3838_v17 = vld [vmem:[%s4456_s30 + $0x3cc] sm:$0xf] }
 0x26c   : > { %2329 = vmatpush.bf16.msrb.mxu0 %v3320_v26  ;;  %2298 = vmatmul.bf16.vlgmr.msra.gmra.mxu1 %v4627_v39  ;;  %v3960_v39 = vld [vmem:[%s4456_s30 + $0x794] sm:$0xf0]  ;;  %v3496_v25 = vor.u32 %v3920_v21, %v3495_v45  ;;  %v3223_v26 = vld [vmem:[%s4456_s30 + $0x428] sm:$0xf]  ;;  %v3177_v43 = vld [vmem:[%s4456_s30 + $0x3d8] sm:$0xf0] }
 0x26d   : > { %2342 = vmatpush.bf16.msrb.mxu1 %v3448_v27  ;;  %2311 = vmatmul.bf16.vlgmr.msra.gmra.mxu2 %v4618_v33  ;;  %v3271_v33 = vld [vmem:[%s4456_s30 + $0x488] sm:$0xf]  ;;  %v3656_v8 = vor.u32 %v3960_v39, %v3655_v1  ;;  %v3952_v22 = vld [vmem:[%s4456_s30 + $0x754] sm:$0xf0] }
 0x26e   : > { %2355 = vmatpush.bf16.msrb.mxu2 %v3576_v28  ;;  %2324 = vmatmul.bf16.vlgmr.msra.gmra.mxu3 %v4622_v35  ;;  %v3527_v35 = vld [vmem:[%s4456_s30 + $0x688] sm:$0xf]  ;;  %v3272_v2 = vor.u32 %v3864_v61, %v3271_v33  ;;  %v3852_v27 = vld [vmem:[%s4456_s30 + $0x434] sm:$0xf0]  ;;  %v3624_v30 = vor.u32 %v3952_v22, %v3623_v47  ;;  %v2809_v33 = vld [vmem:[%s4456_s30 + $0xf8] sm:$0xf0] }
 0x26f   : > { %2368 = vmatpush.bf16.msrb.mxu3 %v3704_v32  ;;  %v3528_v4 = vor.u32 %v3928_v0, %v3527_v35  ;;  %v3351_v28 = vld [vmem:[%s4456_s30 + $0x528] sm:$0xf]  ;;  %v3884_v31 = vld [vmem:[%s4456_s30 + $0x534] sm:$0xf0]  ;;  %v3224_v41 = vor.u32 %v3852_v27, %v3223_v26  ;;  %v3778_v61 = vld [vmem:[%s4456_s30 + $0x1ec] sm:$0xf]  ;;  %v2093_v5 = vpop.f32.mrf.mxu1 }
 0x270   : > { %2330 = vmatpush.bf16.msrb.mxu0 %v3304_v44  ;;  %v3479_v32 = vld [vmem:[%s4456_s30 + $0x628] sm:$0xf]  ;;  %v3916_v36 = vld [vmem:[%s4456_s30 + $0x634] sm:$0xf0]  ;;  %v3065_v35 = vld [vmem:[%s4456_s30 + $0x2f8] sm:$0xf0] }
 0x271   : > { %2343 = vmatpush.bf16.msrb.mxu1 %v3432_v48  ;;  %v3607_v38 = vld [vmem:[%s4456_s30 + $0x728] sm:$0xf]  ;;  %v3948_v40 = vld [vmem:[%s4456_s30 + $0x734] sm:$0xf0]  ;;  %v3480_v50 = vor.u32 %v3916_v36, %v3479_v32  ;;  %v3068_v9 = vor.u32 %v3810_v63, %v3065_v35  ;;  %v3738_v47 = vld [vmem:[%s4456_s30 + $0xac] sm:$0xf] }
 0x272   : > { %2356 = vmatpush.bf16.msrb.mxu2 %v3560_v49  ;;  %v3207_v44 = vld [vmem:[%s4456_s30 + $0x408] sm:$0xf]  ;;  %v3848_v48 = vld [vmem:[%s4456_s30 + $0x414] sm:$0xf0]  ;;  %v3352_v49 = vor.u32 %v3884_v31, %v3351_v28  ;;  %v3608_v54 = vor.u32 %v3948_v40, %v3607_v38  ;;  %v2777_v22 = vld [vmem:[%s4456_s30 + $0xb8] sm:$0xf0] }
 0x273   : > { %2369 = vmatpush.bf16.msrb.mxu3 %v3688_v52  ;;  %v3335_v42 = vld [vmem:[%s4456_s30 + $0x508] sm:$0xf]  ;;  %v3880_v46 = vld [vmem:[%s4456_s30 + $0x514] sm:$0xf0]  ;;  %v3208_v62 = vor.u32 %v3848_v48, %v3207_v44  ;;  %v3802_v26 = vld [vmem:[%s4456_s30 + $0x2ac] sm:$0xf]  ;;  %v2780_v32 = vor.u32 %v3738_v47, %v2777_v22 }
 0x274   : > { %2331 = vmatpush.bf16.msrb.mxu0 %v3288_v58  ;;  %v3463_v52 = vld [vmem:[%s4456_s30 + $0x608] sm:$0xf]  ;;  %v3912_v55 = vld [vmem:[%s4456_s30 + $0x614] sm:$0xf0]  ;;  %v3336_v39 = vor.u32 %v3880_v46, %v3335_v42  ;;  %v3033_v27 = vld [vmem:[%s4456_s30 + $0x2b8] sm:$0xf0] }
 0x275   : > { %2344 = vmatpush.bf16.msrb.mxu1 %v3416_v59  ;;  %v3591_v56 = vld [vmem:[%s4456_s30 + $0x708] sm:$0xf]  ;;  %v3944_v57 = vld [vmem:[%s4456_s30 + $0x714] sm:$0xf0]  ;;  %v3161_v31 = vld [vmem:[%s4456_s30 + $0x3b8] sm:$0xf0]  ;;  %v3036_v38 = vor.u32 %v3802_v26, %v3033_v27 }
 0x276   : > { %2357 = vmatpush.bf16.msrb.mxu2 %v3544_v60  ;;  %v3746_v60 = vld [vmem:[%s4456_s30 + $0xec] sm:$0xf]  ;;  %v3592_v6 = vor.u32 %v3944_v57, %v3591_v56  ;;  %v4965_v28 = vld [vmem:[#allocation1 + $0x24] sm:$0xff]  ;;  %v4973_v36 = vld [vmem:[#allocation1 + $0x2d] sm:$0xff] }
 0x277   : > { %2370 = vmatpush.bf16.msrb.mxu3 %v3672_v34  ;;  %v2078_v24 = vpop.f32.mrf.mxu0  ;;  %v2937_v34 = vld [vmem:[%s4456_s30 + $0x1f8] sm:$0xf0]  ;;  %v2812_v7 = vor.u32 %v3746_v60, %v2809_v33  ;;  %v3734_v40 = vld [vmem:[%s4456_s30 + $0x8c] sm:$0xf] }
 0x278   : > { %2332 = vmatpush.bf16.msrb.mxu0 %v3272_v2  ;;  %v2092_v37 = vadd.f32 %v2091_v29, %v2078_v24  ;;  %v3464_v2 = vor.u32 %v3912_v55, %v3463_v52  ;;  %v3180_v24 = vor.u32 %v3838_v17, %v3177_v43  ;;  %v4968_v29 = vld [vmem:[#allocation1 + $0x3f] sm:$0xff]  ;;  %v3017_v42 = vld [vmem:[%s4456_s30 + $0x298] sm:$0xf0] }
 0x279   : > { %2345 = vmatpush.bf16.msrb.mxu1 %v3400_v3  ;;  %v3842_v3 = vld [vmem:[%s4456_s30 + $0x3ec] sm:$0xf]  ;;  %v3145_v52 = vld [vmem:[%s4456_s30 + $0x398] sm:$0xf0] }
 0x27a   : > { %2358 = vmatpush.bf16.msrb.mxu2 %v3528_v4  ;;  %v3193_v4 = vld [vmem:[%s4456_s30 + $0x3f8] sm:$0xf0]  ;;  %v3766_v44 = vld [vmem:[%s4456_s30 + $0x18c] sm:$0xf] }
 0x27b   : > { %2371 = vmatpush.bf16.msrb.mxu3 %v3656_v8  ;;  %v2940_v8 = vor.u32 %v3778_v61, %v2937_v34  ;;  %v3196_v13 = vor.u32 %v3842_v3, %v3193_v4  ;;  %v3830_v46 = vld [vmem:[%s4456_s30 + $0x38c] sm:$0xf]  ;;  %v3001_v63 = vld [vmem:[%s4456_s30 + $0x278] sm:$0xf0] }
 0x27c   : > { %2333 = vmatpush.bf16.msrb.mxu0 %v3256_v14  ;;  %v2921_v14 = vld [vmem:[%s4456_s30 + $0x1d8] sm:$0xf0]  ;;  %v3730_v57 = vld [vmem:[%s4456_s30 + $0x6c] sm:$0xf]  ;;  %v3148_v61 = vor.u32 %v3830_v46, %v3145_v52 }
 0x27d   : > { %2346 = vmatpush.bf16.msrb.mxu1 %v3384_v15  ;;  %v2104_v53 = vpop.f32.mrf.mxu2  ;;  %v3806_v15 = vld [vmem:[%s4456_s30 + $0x2cc] sm:$0xf]  ;;  %v2924_v45 = vor.u32 %v3774_v12, %v2921_v14  ;;  %v2729_v5 = vld [vmem:[%s4456_s30 + $0x58] sm:$0xf0] }
 0x27e   : > { %2359 = vmatpush.bf16.msrb.mxu2 %v3512_v16  ;;  %v2105_v58 = vadd.f32 %v2104_v53, %v2092_v37  ;;  %v2117_v59 = vpop.f32.mrf.mxu3  ;;  %v3049_v16 = vld [vmem:[%s4456_s30 + $0x2d8] sm:$0xf0]  ;;  %v3794_v34 = vld [vmem:[%s4456_s30 + $0x26c] sm:$0xf] }
 0x27f   : > { %2372 = vmatpush.bf16.msrb.mxu3 %v3640_v19  ;;  %v2080_v1 = vpop.f32.mrf.mxu0  ;;  %v2796_v19 = vor.u32 %v3742_v10, %v2793_v11  ;;  %v3052_v21 = vor.u32 %v3806_v15, %v3049_v16  ;;  %v3826_v35 = vld [vmem:[%s4456_s30 + $0x36c] sm:$0xf]  ;;  %v3004_v3 = vor.u32 %v3794_v34, %v3001_v63  ;;  %v2985_v11 = vld [vmem:[%s4456_s30 + $0x258] sm:$0xf0] }
 0x280   : > { %2334 = vmatpush.bf16.msrb.mxu0 %v3240_v23  ;;  %v4944_v0 = vadd.f32 %v2117_v59, %v2105_v58  ;;  %v3770_v23 = vld [vmem:[%s4456_s30 + $0x1ac] sm:$0xf]  ;;  %v2745_v58 = vld [vmem:[%s4456_s30 + $0x78] sm:$0xf0] }
 0x281   : > { %2347 = vmatpush.bf16.msrb.mxu1 %v3368_v51  ;;  %v4959_v51 = vld [vmem:[#allocation1 + $0x36] sm:$0xff]  ;;  %v3762_v59 = vld [vmem:[%s4456_s30 + $0x16c] sm:$0xf]  ;;  %v3129_v1 = vld [vmem:[%s4456_s30 + $0x378] sm:$0xf0] }
 0x282   : > { %2360 = vmatpush.bf16.msrb.mxu2 %v3496_v25  ;;  %v2905_v25 = vld [vmem:[%s4456_s30 + $0x1b8] sm:$0xf0]  ;;  %v3726_v4 = vld [vmem:[%s4456_s30 + $0x4c] sm:$0xf] }
 0x283   : > { %2373 = vmatpush.bf16.msrb.mxu3 %v3624_v30  ;;  %v3834_v30 = vld [vmem:[%s4456_s30 + $0x3ac] sm:$0xf]  ;;  %v2908_v37 = vor.u32 %v3770_v23, %v2905_v25  ;;  %v3113_v15 = vld [vmem:[%s4456_s30 + $0x358] sm:$0xf0]  ;;  %v2732_v16 = vor.u32 %v3726_v4, %v2729_v5 }
 0x284   : > { %2335 = vmatpush.bf16.msrb.mxu0 %v3224_v41  ;;  %v2761_v41 = vld [vmem:[%s4456_s30 + $0x98] sm:$0xf0]  ;;  %v3164_v48 = vor.u32 %v3834_v30, %v3161_v31  ;;  %v3790_v10 = vld [vmem:[%s4456_s30 + $0x24c] sm:$0xf] }
 0x285   : > { %2348 = vmatpush.bf16.msrb.mxu1 %v3352_v49  ;;  %v2106_v18 = vpop.f32.mrf.mxu2  ;;  %v2889_v49 = vld [vmem:[%s4456_s30 + $0x198] sm:$0xf0]  ;;  %v2764_v53 = vor.u32 %v3734_v40, %v2761_v41  ;;  %v3822_v14 = vld [vmem:[%s4456_s30 + $0x34c] sm:$0xf] }
 0x286   : > { %2361 = vmatpush.bf16.msrb.mxu2 %v3480_v50  ;;  %v2119_v20 = vpop.f32.mrf.mxu3  ;;  %v3798_v50 = vld [vmem:[%s4456_s30 + $0x28c] sm:$0xf]  ;;  %v2892_v55 = vor.u32 %v3766_v44, %v2889_v49  ;;  %v3116_v22 = vor.u32 %v3822_v14, %v3113_v15  ;;  %v2841_v23 = vld [vmem:[%s4456_s30 + $0x138] sm:$0xf0] }
 0x287   : > { %2374 = vmatpush.bf16.msrb.mxu3 %v3608_v54  ;;  %v3020_v56 = vor.u32 %v3798_v50, %v3017_v42  ;;  %v3722_v20 = vld [vmem:[%s4456_s30 + $0x2c] sm:$0xf]  ;;  %v2969_v25 = vld [vmem:[%s4456_s30 + $0x238] sm:$0xf0] }
 0x288   : > { %2336 = vmatpush.bf16.msrb.mxu0 %v3208_v62  ;;  %v2130_v54 = vpop.f32.mrf.mxu0  ;;  %v2873_v62 = vld [vmem:[%s4456_s30 + $0x178] sm:$0xf0]  ;;  %v3818_v26 = vld [vmem:[%s4456_s30 + $0x32c] sm:$0xf] }
 0x289   : > { %2349 = vmatpush.bf16.msrb.mxu1 %v3336_v39  ;;  %v2131_v60 = vadd.f32 %v2130_v54, %v4944_v0  ;;  %v2143_v33 = vpop.f32.mrf.mxu1  ;;  %v2876_v0 = vor.u32 %v3762_v59, %v2873_v62  ;;  %v3097_v27 = vld [vmem:[%s4456_s30 + $0x338] sm:$0xf0]  ;;  %v3718_v31 = vld [vmem:[%s4456_s30 + $0xc] sm:$0xf] }
 0x28a   : > { %2362 = vmatpush.bf16.msrb.mxu2 %v3464_v2  ;;  %v2748_v2 = vor.u32 %v3730_v57, %v2745_v58  ;;  %v3750_v40 = vld [vmem:[%s4456_s30 + $0x10c] sm:$0xf]  ;;  %v2825_v41 = vld [vmem:[%s4456_s30 + $0x118] sm:$0xf0]  ;;  %v3100_v49 = vor.u32 %v3818_v26, %v3097_v27 }
 0x28b   : > { %2375 = vmatpush.bf16.msrb.mxu3 %v3592_v6  ;;  %2337 = vmatmul.bf16.vlgmr.msrb.gmra.mxu0 %v4965_v28  ;;  %v2144_v39 = vadd.f32 %v2143_v33, %v2131_v60  ;;  %v3758_v6 = vld [vmem:[%s4456_s30 + $0x14c] sm:$0xf]  ;;  %v2953_v50 = vld [vmem:[%s4456_s30 + $0x218] sm:$0xf0]  ;;  %v2828_v60 = vor.u32 %v3750_v40, %v2825_v41 }
 0x28c   : > { %2381 = vmatpush.bf16.msra.mxu0 %v2812_v7  ;;  %2350 = vmatmul.bf16.vlgmr.msrb.gmra.mxu1 %v4973_v36  ;;  %v3782_v44 = vld [vmem:[%s4456_s30 + $0x20c] sm:$0xf]  ;;  %v3081_v46 = vld [vmem:[%s4456_s30 + $0x318] sm:$0xf0] }
 0x28d   : > { %2394 = vmatpush.bf16.msra.mxu1 %v2940_v8  ;;  %2363 = vmatmul.bf16.vlgmr.msrb.gmra.mxu2 %v4959_v51  ;;  %v3132_v8 = vor.u32 %v3826_v35, %v3129_v1  ;;  %v3814_v42 = vld [vmem:[%s4456_s30 + $0x30c] sm:$0xf]  ;;  %v3321_v54 = vld [vmem:[%s4456_s30 + $0x4f8] sm:$0xf0]  ;;  %v2956_v33 = vor.u32 %v3782_v44, %v2953_v50 }
 0x28e   : > { %2407 = vmatpush.bf16.msra.mxu2 %v3068_v9  ;;  %2376 = vmatmul.bf16.vlgmr.msrb.gmra.mxu3 %v4968_v29  ;;  %v2857_v9 = vld [vmem:[%s4456_s30 + $0x158] sm:$0xf0]  ;;  %v3938_v58 = vld [vmem:[%s4456_s30 + $0x6ec] sm:$0xf]  ;;  %v3084_v34 = vor.u32 %v3814_v42, %v3081_v46 }
 0x28f   : > { %2420 = vmatpush.bf16.msra.mxu3 %v3196_v13  ;;  %v2860_v18 = vor.u32 %v3758_v6, %v2857_v9  ;;  %v3449_v57 = vld [vmem:[%s4456_s30 + $0x5f8] sm:$0xf0]  ;;  %v3934_v5 = vld [vmem:[%s4456_s30 + $0x6cc] sm:$0xf] }
 0x290   : > { %2382 = vmatpush.bf16.msra.mxu0 %v2796_v19  ;;  %v2156_v7 = vpop.f32.mrf.mxu2  ;;  %v2132_v43 = vpop.f32.mrf.mxu0  ;;  %v2988_v19 = vor.u32 %v3790_v10, %v2985_v11  ;;  %v3577_v59 = vld [vmem:[%s4456_s30 + $0x6f8] sm:$0xf0]  ;;  %v3898_v14 = vld [vmem:[%s4456_s30 + $0x5ac] sm:$0xf] }
 0x291   : > { %2395 = vmatpush.bf16.msra.mxu1 %v2924_v45  ;;  %v2157_v12 = vadd.f32 %v2156_v7, %v2144_v39  ;;  %v2169_v13 = vpop.f32.mrf.mxu3  ;;  %v2713_v45 = vld [vmem:[%s4456_s30 + $0x38] sm:$0xf0]  ;;  %v2145_v47 = vpop.f32.mrf.mxu1  ;;  %v3580_v1 = vor.u32 %v3938_v58, %v3577_v59  ;;  %v3870_v39 = vld [vmem:[%s4456_s30 + $0x4cc] sm:$0xf] }
 0x292   : > { %2408 = vmatpush.bf16.msra.mxu2 %v3052_v21  ;;  %v3754_v21 = vld [vmem:[%s4456_s30 + $0x12c] sm:$0xf]  ;;  %v2716_v30 = vor.u32 %v3722_v20, %v2713_v45  ;;  %v3705_v62 = vld [vmem:[%s4456_s30 + $0x7f8] sm:$0xf0] }
 0x293   : > { %2421 = vmatpush.bf16.msra.mxu3 %v3180_v24  ;;  %v5001_v17 = vadd.f32 %v2169_v13, %v2157_v12  ;;  %v3786_v24 = vld [vmem:[%s4456_s30 + $0x22c] sm:$0xf]  ;;  %v3433_v4 = vld [vmem:[%s4456_s30 + $0x5d8] sm:$0xf0] }
 0x294   : > { %2383 = vmatpush.bf16.msra.mxu0 %v2780_v32  ;;  %v2697_v32 = vld [vmem:[%s4456_s30 + $0x18] sm:$0xf0]  ;;  %v3966_v7 = vld [vmem:[%s4456_s30 + $0x7cc] sm:$0xf] }
 0x295   : > { %2396 = vmatpush.bf16.msra.mxu1 %v2908_v37  ;;  %v2844_v37 = vor.u32 %v3754_v21, %v2841_v23  ;;  %v3561_v6 = vld [vmem:[%s4456_s30 + $0x6d8] sm:$0xf0]  ;;  %v3866_v12 = vld [vmem:[%s4456_s30 + $0x4ac] sm:$0xf] }
 0x296   : > { %2409 = vmatpush.bf16.msra.mxu2 %v3036_v38  ;;  %v2972_v38 = vor.u32 %v3786_v24, %v2969_v25  ;;  %v3564_v11 = vor.u32 %v3934_v5, %v3561_v6  ;;  %v3289_v13 = vld [vmem:[%s4456_s30 + $0x4b8] sm:$0xf0]  ;;  %v3962_v20 = vld [vmem:[%s4456_s30 + $0x7ac] sm:$0xf] }
 0x297   : > { %2422 = vmatpush.bf16.msra.mxu3 %v3164_v48  ;;  %v3417_v43 = vld [vmem:[%s4456_s30 + $0x5b8] sm:$0xf0]  ;;  %v4086_v21 = vld [vmem:[#allocation1] sm:$0xff] }
 0x298   : > { %2384 = vmatpush.bf16.msra.mxu0 %v2764_v53  ;;  %v2158_v48 = vpop.f32.mrf.mxu2  ;;  %v3874_v53 = vld [vmem:[%s4456_s30 + $0x4ec] sm:$0xf]  ;;  %v3673_v45 = vld [vmem:[%s4456_s30 + $0x7b8] sm:$0xf0]  ;;  %v3420_v24 = vor.u32 %v3898_v14, %v3417_v43 }
 0x299   : > { %2397 = vmatpush.bf16.msra.mxu1 %v2892_v55  ;;  %v2171_v52 = vpop.f32.mrf.mxu3  ;;  %v3906_v55 = vld [vmem:[%s4456_s30 + $0x5ec] sm:$0xf]  ;;  %v3324_v63 = vor.u32 %v3874_v53, %v3321_v54  ;;  %v4088_v23 = vld [vmem:[#allocation1 + $0x9] sm:$0xff] }
 0x29a   : > { %2410 = vmatpush.bf16.msra.mxu2 %v3020_v56  ;;  %v2700_v56 = vor.u32 %v3718_v31, %v2697_v32  ;;  %v3452_v35 = vor.u32 %v3906_v55, %v3449_v57  ;;  %v4087_v47 = vld [vmem:[#allocation1 + $0x1b] sm:$0xff]  ;;  %v3273_v27 = vld [vmem:[%s4456_s30 + $0x498] sm:$0xf0]  ;;  %v3676_v31 = vor.u32 %v3962_v20, %v3673_v45 }
 0x29b   : > { %2423 = vmatpush.bf16.msra.mxu3 %v3148_v61  ;;  %v3970_v61 = vld [vmem:[%s4456_s30 + $0x7ec] sm:$0xf]  ;;  %v3401_v32 = vld [vmem:[%s4456_s30 + $0x598] sm:$0xf0] }
 0x29c   : > { %2385 = vmatpush.bf16.msra.mxu0 %v2748_v2  ;;  %v3305_v2 = vld [vmem:[%s4456_s30 + $0x4d8] sm:$0xf0]  ;;  %v3862_v26 = vld [vmem:[%s4456_s30 + $0x48c] sm:$0xf] }
 0x29d   : > { %2398 = vmatpush.bf16.msra.mxu1 %v2876_v0  ;;  %v3902_v0 = vld [vmem:[%s4456_s30 + $0x5cc] sm:$0xf]  ;;  %v3308_v9 = vor.u32 %v3870_v39, %v3305_v2  ;;  %v3657_v41 = vld [vmem:[%s4456_s30 + $0x798] sm:$0xf0]  ;;  %v3276_v44 = vor.u32 %v3862_v26, %v3273_v27 }
 0x29e   : > { %2411 = vmatpush.bf16.msra.mxu2 %v3004_v3  ;;  %v3708_v3 = vor.u32 %v3970_v61, %v3705_v62  ;;  %v3436_v10 = vor.u32 %v3902_v0, %v3433_v4  ;;  %v3958_v40 = vld [vmem:[%s4456_s30 + $0x78c] sm:$0xf]  ;;  %v3257_v46 = vld [vmem:[%s4456_s30 + $0x478] sm:$0xf0] }
 0x29f   : > { %2424 = vmatpush.bf16.msra.mxu3 %v3132_v8  ;;  %v3689_v8 = vld [vmem:[%s4456_s30 + $0x7d8] sm:$0xf0]  ;;  %v3858_v42 = vld [vmem:[%s4456_s30 + $0x46c] sm:$0xf]  ;;  %v3660_v54 = vor.u32 %v3958_v40, %v3657_v41 }
 0x2a0   : > { %2386 = vmatpush.bf16.msra.mxu0 %v2732_v16  ;;  %v3692_v15 = vor.u32 %v3966_v7, %v3689_v8  ;;  %v4085_v16 = vld [vmem:[#allocation1 + $0x12] sm:$0xff]  ;;  %v3890_v52 = vld [vmem:[%s4456_s30 + $0x56c] sm:$0xf]  ;;  %v3385_v55 = vld [vmem:[%s4456_s30 + $0x578] sm:$0xf0] }
 0x2a1   : > { %2399 = vmatpush.bf16.msra.mxu1 %v2860_v18  ;;  %v3930_v18 = vld [vmem:[%s4456_s30 + $0x6ac] sm:$0xf]  ;;  %v3513_v57 = vld [vmem:[%s4456_s30 + $0x678] sm:$0xf0]  ;;  %v3388_v61 = vor.u32 %v3890_v52, %v3385_v55 }
 0x2a2   : > { %2412 = vmatpush.bf16.msra.mxu2 %v2988_v19  ;;  %v3545_v19 = vld [vmem:[%s4456_s30 + $0x6b8] sm:$0xf0]  ;;  %v3954_v59 = vld [vmem:[%s4456_s30 + $0x76c] sm:$0xf] }
 0x2a3   : > { %2425 = vmatpush.bf16.msra.mxu3 %v3116_v22  ;;  %v3292_v22 = vor.u32 %v3866_v12, %v3289_v13  ;;  %v3548_v25 = vor.u32 %v3930_v18, %v3545_v19  ;;  %v3369_v2 = vld [vmem:[%s4456_s30 + $0x558] sm:$0xf0]  ;;  %v3918_v0 = vld [vmem:[%s4456_s30 + $0x64c] sm:$0xf] }
 0x2a4   : > { %2387 = vmatpush.bf16.msra.mxu0 %v2716_v30  ;;  %v3894_v30 = vld [vmem:[%s4456_s30 + $0x58c] sm:$0xf]  ;;  %v3625_v7 = vld [vmem:[%s4456_s30 + $0x758] sm:$0xf0] }
 0x2a5   : > { %2400 = vmatpush.bf16.msra.mxu1 %v2844_v37  ;;  %v3926_v37 = vld [vmem:[%s4456_s30 + $0x68c] sm:$0xf]  ;;  %v3225_v14 = vld [vmem:[%s4456_s30 + $0x438] sm:$0xf0] }
 0x2a6   : > { %2413 = vmatpush.bf16.msra.mxu2 %v2972_v38  ;;  %v3529_v38 = vld [vmem:[%s4456_s30 + $0x698] sm:$0xf0]  ;;  %v3950_v6 = vld [vmem:[%s4456_s30 + $0x74c] sm:$0xf] }
 0x2a7   : > { %2426 = vmatpush.bf16.msra.mxu3 %v3100_v49  ;;  %v3404_v49 = vor.u32 %v3894_v30, %v3401_v32  ;;  %v3532_v50 = vor.u32 %v3926_v37, %v3529_v38  ;;  %v3850_v13 = vld [vmem:[%s4456_s30 + $0x42c] sm:$0xf]  ;;  %v3628_v43 = vor.u32 %v3950_v6, %v3625_v7  ;;  %v3353_v18 = vld [vmem:[%s4456_s30 + $0x538] sm:$0xf0] }
 0x2a8   : > { %2388 = vmatpush.bf16.msra.mxu0 %v2700_v56  ;;  %v2182_v48 = vpop.f32.mrf.mxu0  ;;  %v3922_v56 = vld [vmem:[%s4456_s30 + $0x66c] sm:$0xf]  ;;  %v3481_v20 = vld [vmem:[%s4456_s30 + $0x638] sm:$0xf0] }
 0x2a9   : > { %2401 = vmatpush.bf16.msra.mxu1 %v2828_v60  ;;  %v2195_v53 = vpop.f32.mrf.mxu1  ;;  %v3641_v60 = vld [vmem:[%s4456_s30 + $0x778] sm:$0xf0]  ;;  %v3516_v62 = vor.u32 %v3922_v56, %v3513_v57  ;;  %v3914_v19 = vld [vmem:[%s4456_s30 + $0x62c] sm:$0xf] }
 0x2aa   : > { %2414 = vmatpush.bf16.msra.mxu2 %v2956_v33  ;;  %v2196_v58 = vadd.f32 %v2195_v53, %v2182_v48  ;;  %v3260_v33 = vor.u32 %v3858_v42, %v3257_v46  ;;  %v3644_v39 = vor.u32 %v3954_v59, %v3641_v60  ;;  %v3946_v45 = vld [vmem:[%s4456_s30 + $0x72c] sm:$0xf]  ;;  %v3465_v37 = vld [vmem:[%s4456_s30 + $0x618] sm:$0xf0] }
 0x2ab   : > { %2427 = vmatpush.bf16.msra.mxu3 %v3084_v34  ;;  %2389 = vmatmul.bf16.vlgmr.msra.gmra.mxu0 %v4086_v21  ;;  %v3854_v34 = vld [vmem:[%s4456_s30 + $0x44c] sm:$0xf]  ;;  %v3609_v21 = vld [vmem:[%s4456_s30 + $0x738] sm:$0xf0] }
 0x2ac   : > { %2433 = vmatpush.bf16.msrb.mxu0 %v3324_v63  ;;  %2402 = vmatmul.bf16.vlgmr.msra.gmra.mxu1 %v4088_v23  ;;  %v3241_v63 = vld [vmem:[%s4456_s30 + $0x458] sm:$0xf0]  ;;  %v3484_v23 = vor.u32 %v3914_v19, %v3481_v20  ;;  %v3878_v26 = vld [vmem:[%s4456_s30 + $0x50c] sm:$0xf]  ;;  %v3612_v30 = vor.u32 %v3946_v45, %v3609_v21 }
 0x2ad   : > { %2446 = vmatpush.bf16.msrb.mxu1 %v3452_v35  ;;  %2415 = vmatmul.bf16.vlgmr.msra.gmra.mxu2 %v4085_v16  ;;  %v3886_v35 = vld [vmem:[%s4456_s30 + $0x54c] sm:$0xf]  ;;  %v3244_v8 = vor.u32 %v3854_v34, %v3241_v63  ;;  %v3593_v41 = vld [vmem:[%s4456_s30 + $0x718] sm:$0xf0] }
 0x2ae   : > { %2459 = vmatpush.bf16.msrb.mxu2 %v3580_v1  ;;  %2428 = vmatmul.bf16.vlgmr.msra.gmra.mxu3 %v4087_v47  ;;  %v3228_v47 = vor.u32 %v3850_v13, %v3225_v14  ;;  %v3910_v32 = vld [vmem:[%s4456_s30 + $0x60c] sm:$0xf] }
 0x2af   : > { %2472 = vmatpush.bf16.msrb.mxu3 %v3708_v3  ;;  %v3497_v3 = vld [vmem:[%s4456_s30 + $0x658] sm:$0xf0]  ;;  %v3942_v40 = vld [vmem:[%s4456_s30 + $0x70c] sm:$0xf] }
 0x2b0   : > { %2434 = vmatpush.bf16.msrb.mxu0 %v3308_v9  ;;  %v2208_v1 = vpop.f32.mrf.mxu2  ;;  %v3500_v12 = vor.u32 %v3918_v0, %v3497_v3 }
 0x2b1   : > { %2447 = vmatpush.bf16.msrb.mxu1 %v3436_v10  ;;  %v2209_v4 = vadd.f32 %v2208_v1, %v2196_v58  ;;  %v2221_v5 = vpop.f32.mrf.mxu3  ;;  %v2184_v10 = vpop.f32.mrf.mxu0 }
 0x2b2   : > { %2460 = vmatpush.bf16.msrb.mxu2 %v3564_v11  ;;  %v3372_v11 = vor.u32 %v3886_v35, %v3369_v2  ;;  %v2197_v16 = vpop.f32.mrf.mxu1 }
 0x2b3   : > { %2473 = vmatpush.bf16.msrb.mxu3 %v3692_v15  ;;  %v2222_v9 = vadd.f32 %v2221_v5, %v2209_v4  ;;  %v3882_v15 = vld [vmem:[%s4456_s30 + $0x52c] sm:$0xf] }
 0x2b4   : > { %2435 = vmatpush.bf16.msrb.mxu0 %v3292_v22  ;;  %v3356_v22 = vor.u32 %v3882_v15, %v3353_v18 }
 0x2b5   : > { %2448 = vmatpush.bf16.msrb.mxu1 %v3420_v24  ;;  %v3846_v24 = vld [vmem:[%s4456_s30 + $0x40c] sm:$0xf] }
 0x2b6   : > { %2461 = vmatpush.bf16.msrb.mxu2 %v3548_v25  ;;  %v3209_v25 = vld [vmem:[%s4456_s30 + $0x418] sm:$0xf0] }
 0x2b7   : > { %2474 = vmatpush.bf16.msrb.mxu3 %v3676_v31  ;;  %v3337_v31 = vld [vmem:[%s4456_s30 + $0x518] sm:$0xf0] }
 0x2b8   : > { %2436 = vmatpush.bf16.msrb.mxu0 %v3276_v44  ;;  %v2210_v27 = vpop.f32.mrf.mxu2  ;;  %v3212_v44 = vor.u32 %v3846_v24, %v3209_v25  ;;  %v3340_v48 = vor.u32 %v3878_v26, %v3337_v31 }
 0x2b9   : > { %2449 = vmatpush.bf16.msrb.mxu1 %v3404_v49  ;;  %v2223_v38 = vpop.f32.mrf.mxu3  ;;  %v3468_v49 = vor.u32 %v3910_v32, %v3465_v37 }
 0x2ba   : > { %2462 = vmatpush.bf16.msrb.mxu2 %v3532_v50  ;;  %v3596_v50 = vor.u32 %v3942_v40, %v3593_v41 }
 0x2bb   : > { %2475 = vmatpush.bf16.msrb.mxu3 %v3660_v54 }
 0x2bc   : > { %2437 = vmatpush.bf16.msrb.mxu0 %v3260_v33 }
 0x2bd   : > { %2450 = vmatpush.bf16.msrb.mxu1 %v3388_v61 }
 0x2be   : > { %2463 = vmatpush.bf16.msrb.mxu2 %v3516_v62 }
 0x2bf   : > { %2476 = vmatpush.bf16.msrb.mxu3 %v3644_v39 }
 0x2c0   : > { %2438 = vmatpush.bf16.msrb.mxu0 %v3244_v8 }
 0x2c1   : > { %2451 = vmatpush.bf16.msrb.mxu1 %v3372_v11 }
 0x2c2   : > { %2464 = vmatpush.bf16.msrb.mxu2 %v3500_v12 }
 0x2c3   : > { %2477 = vmatpush.bf16.msrb.mxu3 %v3628_v43 }
 0x2c4   : > { %2439 = vmatpush.bf16.msrb.mxu0 %v3228_v47 }
 0x2c5   : > { %2452 = vmatpush.bf16.msrb.mxu1 %v3356_v22 }
 0x2c6   : > { %2465 = vmatpush.bf16.msrb.mxu2 %v3484_v23 }
 0x2c7   : > { %2478 = vmatpush.bf16.msrb.mxu3 %v3612_v30 }
 0x2c8   : > { %2440 = vmatpush.bf16.msrb.mxu0 %v3212_v44  ;;  %v2234_v42 = vpop.f32.mrf.mxu0  ;;  %v2489_v44 = vld [vmem:[%s2488_s24] sm:$0xff] }
 0x2c9   : > { %2453 = vmatpush.bf16.msrb.mxu1 %v3340_v48  ;;  %v2235_v46 = vadd.f32 %v2234_v42, %v2222_v9  ;;  %v2247_v52 = vpop.f32.mrf.mxu1 }
 0x2ca   : > { %2466 = vmatpush.bf16.msrb.mxu2 %v3468_v49 }
 0x2cb   : > { %2479 = vmatpush.bf16.msrb.mxu3 %v3596_v50  ;;  %2441 = vmatmul.bf16.vlgmr.msrb.gmra.mxu0 %v4965_v28  ;;  %v2248_v53 = vadd.f32 %v2247_v52, %v2235_v46 }
 0x2cc   : > { %2454 = vmatmul.bf16.vlgmr.msrb.gmra.mxu1 %v4973_v36 }
 0x2cd   : > { %2467 = vmatmul.bf16.vlgmr.msrb.gmra.mxu2 %v4959_v51 }
 0x2ce   : > { %2480 = vmatmul.bf16.vlgmr.msrb.gmra.mxu3 %v4968_v29 }
 0x2d0   : > { %v2260_v54 = vpop.f32.mrf.mxu2  ;;  %v2236_v58 = vpop.f32.mrf.mxu0 }
 0x2d1   : > { %v2261_v55 = vadd.f32 %v2260_v54, %v2248_v53  ;;  %v2273_v56 = vpop.f32.mrf.mxu3  ;;  %v2249_v59 = vpop.f32.mrf.mxu1 }
 0x2d3   : > { %v2274_v57 = vadd.f32 %v2273_v56, %v2261_v55 }
 0x2d5   : > { %v2494_v60 = vrot.slane %v2274_v57, 6 }
 0x2d7   : > { %v2498_v28 = vsel %vm2497_vm6, %v5001_v17, %v2494_v60 }
 0x2d8   : > { %v2262_v36 = vpop.f32.mrf.mxu2 }
 0x2d9   : > { %v2275_v33 = vpop.f32.mrf.mxu3 }
 0x2e8   : > { %v2286_v51 = vpop.f32.mrf.mxu0 }
 0x2e9   : > { %v2299_v61 = vpop.f32.mrf.mxu1 }
 0x2ea   : > { %v2300_v29 = vadd.f32 %v2299_v61, %v2286_v51 }
 0x2f0   : > { %v2312_v62 = vpop.f32.mrf.mxu2  ;;  %v2288_v1 = vpop.f32.mrf.mxu0 }
 0x2f1   : > { %v2313_v34 = vadd.f32 %v2312_v62, %v2300_v29  ;;  %v2325_v63 = vpop.f32.mrf.mxu3  ;;  %v2301_v39 = vpop.f32.mrf.mxu1 }
 0x2f3   : > { %v2326_v35 = vadd.f32 %v2325_v63, %v2313_v34 }
 0x2f8   : > { %v2314_v2 = vpop.f32.mrf.mxu2 }
 0x2f9   : > { %v2327_v0 = vpop.f32.mrf.mxu3 }
 0x308   : > { %v2338_v3 = vpop.f32.mrf.mxu0 }
 0x309   : > { %v2351_v4 = vpop.f32.mrf.mxu1  ;;  %v2339_v19 = vadd.f32 %v2338_v3, %v2326_v35 }
 0x30b   : > { %v2352_v45 = vadd.f32 %v2351_v4, %v2339_v19 }
 0x310   : > { %v2364_v5 = vpop.f32.mrf.mxu2  ;;  %v2340_v7 = vpop.f32.mrf.mxu0 }
 0x311   : > { %v2377_v6 = vpop.f32.mrf.mxu3  ;;  %v2353_v8 = vpop.f32.mrf.mxu1  ;;  %v2365_v24 = vadd.f32 %v2364_v5, %v2352_v45 }
 0x313   : > { %v2378_v27 = vadd.f32 %v2377_v6, %v2365_v24 }
 0x315   : > { %v2495_v40 = vrot.slane %v2378_v27, 4 }
 0x318   : > { %v2366_v17 = vpop.f32.mrf.mxu2 }
 0x319   : > { %v2379_v9 = vpop.f32.mrf.mxu3 }
 0x328   : > { %v2390_v10 = vpop.f32.mrf.mxu0 }
 0x329   : > { %v2403_v11 = vpop.f32.mrf.mxu1 }
 0x32a   : > { %v2404_v18 = vadd.f32 %v2403_v11, %v2390_v10 }
 0x330   : > { %v2416_v12 = vpop.f32.mrf.mxu2  ;;  %v2392_v14 = vpop.f32.mrf.mxu0 }
 0x331   : > { %v2429_v13 = vpop.f32.mrf.mxu3  ;;  %v2405_v15 = vpop.f32.mrf.mxu1  ;;  %v2417_v20 = vadd.f32 %v2416_v12, %v2404_v18 }
 0x333   : > { %v2430_v21 = vadd.f32 %v2429_v13, %v2417_v20 }
 0x338   : > { %v2418_v16 = vpop.f32.mrf.mxu2 }
 0x339   : > { %v2431_v43 = vpop.f32.mrf.mxu3 }
 0x348   : > { %v2442_v47 = vpop.f32.mrf.mxu0 }
 0x349   : > { %v2455_v22 = vpop.f32.mrf.mxu1  ;;  %v2443_v23 = vadd.f32 %v2442_v47, %v2430_v21 }
 0x34b   : > { %v2456_v25 = vadd.f32 %v2455_v22, %v2443_v23 }
 0x350   : > { %v2468_v26 = vpop.f32.mrf.mxu2  ;;  %v2444_v32 = vpop.f32.mrf.mxu0 }
 0x351   : > { %v2469_v30 = vadd.f32 %v2468_v26, %v2456_v25  ;;  %v2481_v31 = vpop.f32.mrf.mxu3  ;;  %v2457_v37 = vpop.f32.mrf.mxu1 }
 0x353   : > { %v2482_v38 = vadd.f32 %v2481_v31, %v2469_v30 }
 0x355   : > { %v2496_v41 = vrot.slane %v2482_v38, 2 }
 0x357   : > { %v2500_v48 = vsel %vm2499_vm11, %v2495_v40, %v2496_v41 }
 0x358   : > { %v2502_v49 = vsel %vm2501_vm12, %v2498_v28, %v2500_v48  ;;  %v2470_v50 = vpop.f32.mrf.mxu2  ;;  %v2485_v28 = vld [vmem:[#allocation4] sm:$0x3] }
 0x359   : > { %v2504_v42 = vmul.f32 %v2502_v49, %v2489_v44  ;;  %v2483_v46 = vpop.f32.mrf.mxu3 }
 0x35b   : > { %2506 = vst [vmem:[#allocation1] ss:$4 sm:$0xff] %v2504_v42 }
 0x362   : > { %v2507_v52 = vld.sshfl [vmem:[#allocation1] sm:$0xff pattern:$0x73625140]  ;;  %v2508_v53 = vld.sshfl [vmem:[#allocation1 + $0x8] sm:$0xff pattern:$0x73625140] }
 0x363   : > { %v2509_v54 = vld.sshfl [vmem:[#allocation1 + $0x10] sm:$0xff pattern:$0x73625140]  ;;  %v2515_v55 = vsel %vm2497_vm6, %v2507_v52, 0.0  ;;  %v2516_v56 = vsel %vm2497_vm6, %v2508_v53, 0.0 }
 0x364   : > { %v2510_v57 = vld.sshfl [vmem:[#allocation1 + $0x18] sm:$0xff pattern:$0x73625140]  ;;  %v2517_v58 = vadd.f32 %v2516_v56, %v2515_v55  ;;  %v2518_v59 = vsel %vm2497_vm6, %v2509_v54, 0.0 }
 0x365   : > { %v2520_v36 = vsel %vm2497_vm6, %v2510_v57, 0.0 }
 0x366   : > { %v2519_v60 = vadd.f32 %v2518_v59, %v2517_v58 }
 0x368   : > { %v2521_v33 = vadd.f32 %v2520_v36, %v2519_v60 }
 0x36a   : > { %2522 = vadd.xlane.f32.xlu0 %v2521_v33 }
 0x3dc   : > { %2530 = sbr.rel (%p3711_p2) target bundleno = 1376 (0x560), region = 60 }
 0x3dd   : > { %v2523_v51 = vpop.xlane.xlu0 %2522 }
 0x3de   : > { %v2524_v61 = vadd.f32 %v2523_v51, %v2485_v28 }
 0x3e0   : > { %2526 = vst.msk [vmem:[#allocation4] sm:$0x3] %vm2525_vm13, %v2524_v61 }
 0x3e1   : > { %v4320_v62 = vmov 0   ;;  %v4090_v34 = vld [vmem:[#allocation10] ss:$0 sm:$0xff]  ;;  %v4091_v63 = vld [vmem:[#allocation11] ss:$0 sm:$0xff]  ;;  %vm2547_vm14 = vcmask 74752  }
 0x3e2   : > { %4089 = vset.pattern.permute.xlu0 %v4320_v62 }
 0x3e7   : > { %v2531_v29 = vld [vmem:[#allocation4] sm:$0x3] }
 0x3e8   : > { %2535 = vperm.xlu0 %4089, %v2531_v29  }
 0x45a   : > { %v2536_v35 = vpop.permute.xlu0 %2535 }
 0x45b   : > { %v2541_v1 = vmul.f32 %v4090_v34, %v2536_v35 }
 0x45d   : > { %v2546_v39 = vadd.f32 %v4091_v63, %v2541_v1 }
 0x45f   : > { %v2548_v2 = vsel %vm2547_vm14, %v2546_v39, -inf }
 0x460   : > { %2549 = vmax.xlane.f32.xlu0 %v2548_v2 }
 0x4d3   : > { %v2550_v0 = vpop.xlane.xlu0 %2549 }
 0x4d4   : > { %v2551_v3 = vsub.f32 %v2546_v39, %v2550_v0 }
 0x4d6   : > { %v2552_v4 = vmul.f32 1.442695, %v2551_v3 }
 0x4d8   : > { %4092 = vpow2.f32 %v2552_v4 }
 0x4de   : > { %v4093_v5 = vpop.eup %4092 }
 0x4df   : > { %v2554_v6 = vsel %vm2547_vm14, %v4093_v5, 0.0 }
 0x4e0   : > { %2555 = vadd.xlane.f32.xlu1 %v2554_v6 }
 0x553   : > { %v2556_v7 = vpop.xlane.xlu1 %2555 }
 0x554   : > { %4094 = vlog2.f32 %v2556_v7 }
 0x55a   : > { %v4095_v8 = vpop.eup %4094 }
 0x55b   : > { %v2558_v17 = vmul.f32 0.6931472, %v4095_v8 }
 0x55d   : > { %v2559_v9 = vsub.f32 %v2551_v3, %v2558_v17 }
 0x55f   : > { %2560 = vst.msk [vmem:[#allocation13] sm:$0x3] %vm2547_vm14, %v2559_v9 }
 0x560 PF: > { %p4013_p3 = scmp.eq.s32.totalorder %s4376_s21, 1  ;;  %s2571_s6 = sshll.u32 %s5124_s4, 4  ;;  %s2572_s6 = int_to_ptr.hbm [resolvable:$true] %s2571_s6 }
 0x561   : > { %s4321_s7 = smov [#allocation13]  }
 0x562   : > { %s2569_s8 = sshll.u32 %s4321_s7, 4  ;;  %s2570_s8 = int_to_ptr.vmem [resolvable:$true] %s2569_s8 }
 0x563   : > { %3989 = dma.vmem_to_hbm [thread:$0]  (%p4013_p3), %s2570_s8, 32, %s2572_s6, [#allocation7]  }
 0x564   : > { %4285 = dma.done.wait (%p4013_p3), [#allocation7], 32  }
 0x565   : > { %4287 = vsyncadd (%p4013_p3), [#allocation7], 4294967264 }
 0x566 PF: > { %s20_s20 = sadd.s32 1, %s4310_s20   ;;  %s5132_s15 = smov %s4294_s16 }
 0x567   : > { %p17_p4 = scmp.ge.s32.totalorder %s20_s20, 4   ;;  %s5133_s16 = smov %s4298_s17 }
 0x568   : > { %s5134_s17 = smov %s4444_s13  ;;  %s5135_s18 = smov %s4306_s19 }
 0x569   : > { %s5136_s19 = smov %s5138_s25  ;;  %19 = sbr.rel (!%p17_p4) target bundleno = 9 (0x9), region = 101 }
 0x56e   :  { %2585 = vsyncpa [#allocation6], 1 }
 0x56f   :  { %2587 = vsyncpa [#allocation6 + $0x1], 1 }
 0x570   :  { %2588 = vsyncpa [#allocation9], 1 }
 0x571   :  { %2590 = vsyncpa [#allocation9 + $0x1], 1 }
 0x572   :  { %2591 = vsyncpa [#allocation12], 1 }
 0x573   :  { %2592 = vsyncpa [#allocation7], 1 }
 0x574   :  { %2594 = vsyncpa [#allocation7 + $0x1], 1 }

</bundles_post_ra>
